<compile_context>
chip_gen: v7x
topology: tpu7x:2x2x1
jax: 0.10.0
libtpu: 0.0.40
codegen_flags: <defaults>
</compile_context>

<pallas_src>
import functools
import math

import jax
import jax.numpy as jnp
from jax import lax
from jax.experimental import pallas as pl
from jax.experimental.pallas import tpu as pltpu

BN_EPS = 1e-5


def _round_up(x, m):
    return (x + m - 1) // m * m


def _pick_tile(dim, candidates):
    for c in candidates:
        if c <= dim and dim % c == 0:
            return c
    return dim


def _choose_tm(m):
    """Pick batch-row tile tm and padded batch Mp (Mp % tm == 0, tm % 8 == 0)."""
    mp8 = _round_up(m, 8)
    if mp8 <= 512:
        return mp8, mp8
    for t in (512, 256, 128):
        if mp8 % t == 0:
            return t, mp8
    return 256, _round_up(m, 256)


# --------------------------------------------------------------------------
# Kernel 1: h = dropout(x) @ W1  (bf16 MXU, f32 acc) + fused BN statistics.
# The dropout mask is already folded into x; only the 1/(1-p) scale is applied
# here (once, in f32).  Per-(i, j) partial BN sums are written as one full block.
# --------------------------------------------------------------------------

def _linear1_bn_stats_kernel(x_ref, w_ref, h_ref, stats_ref, acc_ref, *, inv_keep):
    k = pl.program_id(2)

    @pl.when(k == 0)
    def _():
        acc_ref[...] = jnp.zeros_like(acc_ref)

    acc_ref[...] += jnp.dot(x_ref[...], w_ref[...],
                            preferred_element_type=jnp.float32)

    @pl.when(k == pl.num_programs(2) - 1)
    def _():
        h = acc_ref[...]
        if inv_keep != 1.0:
            h = h * inv_keep                       # dropout scale, once, in f32
        h_ref[...] = h.astype(h_ref.dtype)         # bf16 intermediate to HBM
        # Per-tile BatchNorm statistics (rows 0/1 = sum / sum-of-squares),
        # written as a single unmasked full-block store.
        s = jnp.sum(h, axis=0, keepdims=True)
        ss = jnp.sum(h * h, axis=0, keepdims=True)
        pad = jnp.zeros((6, h.shape[1]), jnp.float32)
        stats_ref[...] = jnp.concatenate([s, ss, pad], axis=0)[None]


# --------------------------------------------------------------------------
# Kernel 2: y = dropout(relu(bn(h))) @ W2 + b2.
# BN scale/shift are precomputed vectors; ReLU + dropout mask are fused into the
# A-operand load, the 1/(1-p) scale is applied once to the accumulator.
# --------------------------------------------------------------------------

def _bn_relu_linear2_body(h_ref, mask_ref, scale_ref, shift_ref, w_ref, bias_ref,
                          o_ref, acc_ref, inv_keep):
    k = pl.program_id(1)

    @pl.when(k == 0)
    def _():
        acc_ref[...] = jnp.zeros_like(acc_ref)

    a = h_ref[...].astype(jnp.float32) * scale_ref[...] + shift_ref[...]  # BN
    a = jnp.maximum(a, 0.0)                                               # ReLU
    if mask_ref is not None:
        a = a * mask_ref[...].astype(jnp.float32)                         # dropout
    acc_ref[...] += jnp.dot(a.astype(jnp.bfloat16), w_ref[...],
                            preferred_element_type=jnp.float32)

    @pl.when(k == pl.num_programs(1) - 1)
    def _():
        out = acc_ref[...]
        if inv_keep != 1.0:
            out = out * inv_keep
        o_ref[...] = out + bias_ref[...]


# --------------------------------------------------------------------------
# Builders / wrappers
# --------------------------------------------------------------------------

@functools.lru_cache(maxsize=None)
def _build_mlp_forward(M, n_input, n_hidden, n_classes, p_drop, training):
    use_dropout = bool(training) and p_drop > 0.0
    inv_keep = 1.0 / (1.0 - p_drop) if use_dropout else 1.0

    K1p = _round_up(n_input, 128)
    N1p = _round_up(n_hidden, 128)
    N2p = _round_up(n_classes, 128)

    tm, Mp = _choose_tm(M)
    ni = Mp // tm
    tk1 = _pick_tile(K1p, (1024, 512, 256, 128))
    # Full-width N panel for modest hidden sizes: x is streamed exactly once.
    tn1 = N1p if N1p <= 1024 else _pick_tile(N1p, (512, 256, 128))
    tk2 = _pick_tile(N1p, (512, 256, 128))

    kern1 = functools.partial(_linear1_bn_stats_kernel, inv_keep=inv_keep)
    call1 = pl.pallas_call(
        kern1,
        out_shape=(jax.ShapeDtypeStruct((Mp, N1p), jnp.bfloat16),      # h (bf16)
                   jax.ShapeDtypeStruct((ni, 8, N1p), jnp.float32)),   # partial stats
        grid_spec=pltpu.PrefetchScalarGridSpec(
            num_scalar_prefetch=0,
            grid=(ni, N1p // tn1, K1p // tk1),
            in_specs=[pl.BlockSpec((tm, tk1), lambda i, j, k: (i, k)),
                      pl.BlockSpec((tk1, tn1), lambda i, j, k: (k, j))],
            out_specs=[pl.BlockSpec((tm, tn1), lambda i, j, k: (i, j)),
                       pl.BlockSpec((1, 8, tn1), lambda i, j, k: (i, 0, j))],
            scratch_shapes=[pltpu.VMEM((tm, tn1), jnp.float32)]),
        compiler_params=pltpu.CompilerParams(
            dimension_semantics=("parallel", "parallel", "arbitrary")),
    )

    if use_dropout:
        def kern2(h_ref, mask_ref, scale_ref, shift_ref, w_ref, bias_ref,
                  o_ref, acc_ref):
            _bn_relu_linear2_body(h_ref, mask_ref, scale_ref, shift_ref, w_ref,
                                  bias_ref, o_ref, acc_ref, inv_keep)
        in_specs2 = [pl.BlockSpec((tm, tk2), lambda i, k: (i, k)),    # h
                     pl.BlockSpec((tm, tk2), lambda i, k: (i, k)),    # dropout mask
                     pl.BlockSpec((1, tk2), lambda i, k: (0, k)),     # BN scale
                     pl.BlockSpec((1, tk2), lambda i, k: (0, k)),     # BN shift
                     pl.BlockSpec((tk2, N2p), lambda i, k: (k, 0)),   # W2^T
                     pl.BlockSpec((1, N2p), lambda i, k: (0, 0))]     # bias2
    else:
        def kern2(h_ref, scale_ref, shift_ref, w_ref, bias_ref, o_ref, acc_ref):
            _bn_relu_linear2_body(h_ref, None, scale_ref, shift_ref, w_ref,
                                  bias_ref, o_ref, acc_ref, inv_keep)
        in_specs2 = [pl.BlockSpec((tm, tk2), lambda i, k: (i, k)),
                     pl.BlockSpec((1, tk2), lambda i, k: (0, k)),
                     pl.BlockSpec((1, tk2), lambda i, k: (0, k)),
                     pl.BlockSpec((tk2, N2p), lambda i, k: (k, 0)),
                     pl.BlockSpec((1, N2p), lambda i, k: (0, 0))]

    call2 = pl.pallas_call(
        kern2,
        out_shape=jax.ShapeDtypeStruct((Mp, N2p), jnp.float32),
        grid_spec=pltpu.PrefetchScalarGridSpec(
            num_scalar_prefetch=0,
            grid=(ni, N1p // tk2),
            in_specs=in_specs2,
            out_specs=pl.BlockSpec((tm, N2p), lambda i, k: (i, 0)),
            scratch_shapes=[pltpu.VMEM((tm, N2p), jnp.float32)]),
        compiler_params=pltpu.CompilerParams(
            dimension_semantics=("parallel", "arbitrary")),
    )

    def fwd(x2d, rng_key, w1t, gamma, beta, w2t, bias2):
        # Layer-1 dropout mask folded into x (scale applied in-kernel, in f32).
        if use_dropout:
            k1, k2 = jax.random.split(rng_key)
            keep1 = jax.random.bernoulli(k1, 1.0 - p_drop, (M, n_input))
            x2d = jnp.where(keep1, x2d, 0.0)
        xp = jnp.zeros((Mp, K1p), jnp.bfloat16)
        xp = xp.at[:M, :n_input].set(x2d.astype(jnp.bfloat16))

        h, stats = call1(xp, w1t)

        # Reduce per-tile partial sums (tiny) and precompute BN scale/shift once.
        sums = jnp.sum(stats, axis=0)                          # (8, N1p)
        inv_m = 1.0 / M                                        # biased variance
        mean = sums[0] * inv_m
        var = jnp.maximum(sums[1] * inv_m - mean * mean, 0.0)  # clamp: no NaN
        inv_std = lax.rsqrt(var + BN_EPS)
        scale = (gamma[0] * inv_std)[None, :]
        shift = (beta[0] - mean * gamma[0] * inv_std)[None, :]

        if use_dropout:
            keep2 = jax.random.bernoulli(
                k2, 1.0 - p_drop, (Mp, N1p)).astype(jnp.bfloat16)
            out = call2(h, keep2, scale, shift, w2t, bias2)
        else:
            out = call2(h, scale, shift, w2t, bias2)
        return out[:M, :n_classes]

    return jax.jit(fwd)


def init_mlp_params(key, n_input, n_classes, n_hidden=512):
    """PyTorch-default init: Linear kaiming-uniform(a=sqrt(5)) => U(+-1/sqrt(fan_in)),
    BatchNorm1d weight=1 / bias=0.  Weights are stored pre-transposed, zero-padded
    to lane multiples and pre-cast to bf16 once (no per-call pad/cast copies)."""
    K1p = _round_up(n_input, 128)
    N1p = _round_up(n_hidden, 128)
    N2p = _round_up(n_classes, 128)
    kw1, kw2, kb2 = jax.random.split(key, 3)
    b1 = 1.0 / math.sqrt(n_input)
    w1t = jax.random.uniform(kw1, (n_input, n_hidden), jnp.float32, -b1, b1)
    b2 = 1.0 / math.sqrt(n_hidden)
    w2t = jax.random.uniform(kw2, (n_hidden, n_classes), jnp.float32, -b2, b2)
    bias2 = jax.random.uniform(kb2, (n_classes,), jnp.float32, -b2, b2)
    return {
        "n_input": n_input, "n_hidden": n_hidden, "n_classes": n_classes,
        "w1t": jnp.zeros((K1p, N1p), jnp.bfloat16)
                  .at[:n_input, :n_hidden].set(w1t.astype(jnp.bfloat16)),
        "gamma": jnp.zeros((1, N1p), jnp.float32).at[:, :n_hidden].set(1.0),
        "beta": jnp.zeros((1, N1p), jnp.float32),
        "w2t": jnp.zeros((N1p, N2p), jnp.bfloat16)
                  .at[:n_hidden, :n_classes].set(w2t.astype(jnp.bfloat16)),
        "bias2": jnp.zeros((1, N2p), jnp.float32).at[:, :n_classes].set(bias2),
    }


def mlp_forward(x, params, *, p_drop=0.3, training=True, dropout_key=None):
    """Forward pass of MLP (default n_hidden branch), train-mode semantics:
    batch-statistics BatchNorm + active inverted Dropout.  The RNG key is a runtime
    argument, so changing it between training steps does NOT recompile the kernels."""
    # TODO(synk): the n_hidden=None constructor branch (Flatten->Dropout->Linear w/ bias)
    #             and eval-mode BatchNorm (running statistics) are not implemented;
    #             only the default n_hidden path in train mode is.
    B = x.shape[0]
    x2d = x.reshape(B, -1)                                    # Flatten()
    assert x2d.shape[1] == params["n_input"], (x2d.shape, params["n_input"])
    if dropout_key is None:
        dropout_key = jax.random.PRNGKey(0)
    fwd = _build_mlp_forward(B, params["n_input"], params["n_hidden"],
                             params["n_classes"], float(p_drop), bool(training))
    return fwd(x2d, dropout_key, params["w1t"], params["gamma"], params["beta"],
               params["w2t"], params["bias2"])


if __name__ == "__main__":
    key = jax.random.PRNGKey(0)
    kx, kp, kd = jax.random.split(key, 3)
    # Input consistent with Flatten(): (batch=2, channels=4, 16, 16) -> n_input=1024
    x = jax.random.normal(kx, (2, 4, 16, 16), jnp.float32)
    params = init_mlp_params(kp, n_input=4 * 16 * 16, n_classes=10, n_hidden=512)
    out = mlp_forward(x, params, p_drop=0.3, training=True, dropout_key=kd)
    jax.block_until_ready(out)
    assert out.shape == (2, 10), out.shape
    assert bool(jnp.all(jnp.isfinite(out)))
    print("KERNEL_OK")
</pallas_src>

<mosaic_0001>
module attributes {stable_mosaic.version = 11 : i64} {
  func.func @_linear1_bn_stats_kernel(%arg0: i32, %arg1: i32, %arg2: i32, %arg3: memref<8x1024xbf16, #tpu.memory_space<vmem>>, %arg4: memref<1024x512xbf16, #tpu.memory_space<vmem>>, %arg5: memref<8x512xbf16, #tpu.memory_space<vmem>>, %arg6: memref<1x8x512xf32, #tpu.memory_space<vmem>>, %arg7: memref<8x512xf32, #tpu.memory_space<vmem>>) attributes {dimension_semantics = [#tpu.dimension_semantics<parallel>, #tpu.dimension_semantics<parallel>, #tpu.dimension_semantics<arbitrary>], iteration_bounds = array<i64: 1, 1, 1>, scalar_prefetch = 0 : i64, scratch_operands = 1 : i64, tpu.core_type = #tpu.core_type<tc>, window_params = [{transform_indices = @transform_0, window_bounds = array<i64: 8, 1024>}, {transform_indices = @transform_1, window_bounds = array<i64: 1024, 512>}, {transform_indices = @transform_2, window_bounds = array<i64: 8, 512>}, {transform_indices = @transform_3, window_bounds = array<i64: 1, 8, 512>}]} {
    %c0_i32 = arith.constant 0 : i32
    %0 = arith.cmpi eq, %arg2, %c0_i32 : i32
    %1 = arith.extui %0 : i1 to i32
    %c0_i32_0 = arith.constant 0 : i32
    %2 = arith.cmpi ne, %1, %c0_i32_0 : i32
    scf.if %2 {
      %cst_10 = arith.constant 0.000000e+00 : f32
      %12 = vector.broadcast %cst_10 : f32 to vector<8x512xf32>
      %c0_11 = arith.constant 0 : index
      %c0_12 = arith.constant 0 : index
      %13 = vector.load %arg7[%c0_11, %c0_12] : memref<8x512xf32, #tpu.memory_space<vmem>>, vector<8x512xf32>
      tpu.vector_store %arg7[%c0_11, %c0_12], %12 {strides = array<i32>} : memref<8x512xf32, #tpu.memory_space<vmem>>, vector<8x512xf32>,
    } else {
    }
    %c0 = arith.constant 0 : index
    %c0_1 = arith.constant 0 : index
    %3 = vector.load %arg7[%c0, %c0_1] : memref<8x512xf32, #tpu.memory_space<vmem>>, vector<8x512xf32>
    %c0_2 = arith.constant 0 : index
    %c0_3 = arith.constant 0 : index
    %4 = vector.load %arg3[%c0_2, %c0_3] : memref<8x1024xbf16, #tpu.memory_space<vmem>>, vector<8x1024xbf16>
    %c0_4 = arith.constant 0 : index
    %c0_5 = arith.constant 0 : index
    %5 = vector.load %arg4[%c0_4, %c0_5] : memref<1024x512xbf16, #tpu.memory_space<vmem>>, vector<1024x512xbf16>
    %cst = arith.constant dense<0.000000e+00> : vector<8x512xf32>
    %6 = tpu.matmul %4, %5, %cst {dimension_numbers = #tpu.dot_dimension_numbers<[1], [0], [0], [1], [0, 0, 1, 1], [], []>} : vector<8x1024xbf16>, vector<1024x512xbf16>, vector<8x512xf32> -> vector<8x512xf32>
    %7 = arith.addf %3, %6 : vector<8x512xf32>
    %c0_6 = arith.constant 0 : index
    %c0_7 = arith.constant 0 : index
    %8 = vector.load %arg7[%c0_6, %c0_7] : memref<8x512xf32, #tpu.memory_space<vmem>>, vector<8x512xf32>
    tpu.vector_store %arg7[%c0_6, %c0_7], %7 {strides = array<i32>} : memref<8x512xf32, #tpu.memory_space<vmem>>, vector<8x512xf32>,
    %c0_i32_8 = arith.constant 0 : i32
    %9 = arith.cmpi eq, %arg2, %c0_i32_8 : i32
    %10 = arith.extui %9 : i1 to i32
    %c0_i32_9 = arith.constant 0 : i32
    %11 = arith.cmpi ne, %10, %c0_i32_9 : i32
    scf.if %11 {
      %c0_10 = arith.constant 0 : index
      %c0_11 = arith.constant 0 : index
      %12 = vector.load %arg7[%c0_10, %c0_11] : memref<8x512xf32, #tpu.memory_space<vmem>>, vector<8x512xf32>
      %cst_12 = arith.constant 1.42857146 : f32
      %13 = vector.broadcast %cst_12 : f32 to vector<8x512xf32>
      %14 = arith.mulf %12, %13 : vector<8x512xf32>
      %15 = arith.truncf %14 : vector<8x512xf32> to vector<8x512xbf16>
      %c0_13 = arith.constant 0 : index
      %c0_14 = arith.constant 0 : index
      %16 = vector.load %arg5[%c0_13, %c0_14] : memref<8x512xbf16, #tpu.memory_space<vmem>>, vector<8x512xbf16>
      tpu.vector_store %arg5[%c0_13, %c0_14], %15 {strides = array<i32>} : memref<8x512xbf16, #tpu.memory_space<vmem>>, vector<8x512xbf16>,
      %cst_15 = arith.constant dense<0.000000e+00> : vector<512xf32>
      %17 = vector.multi_reduction <add>, %14, %cst_15 [0] : vector<8x512xf32> to vector<512xf32>
      %18 = vector.shape_cast %17 : vector<512xf32> to vector<1x512xf32>
      %19 = arith.mulf %14, %14 : vector<8x512xf32>
      %cst_16 = arith.constant dense<0.000000e+00> : vector<512xf32>
      %20 = vector.multi_reduction <add>, %19, %cst_16 [0] : vector<8x512xf32> to vector<512xf32>
      %21 = vector.shape_cast %20 : vector<512xf32> to vector<1x512xf32>
      %cst_17 = arith.constant 0.000000e+00 : f32
      %22 = vector.broadcast %cst_17 : f32 to vector<6x512xf32>
      %23 = tpu.concatenate %18, %21, %22 in 0 : vector<1x512xf32>, vector<1x512xf32>, vector<6x512xf32> -> vector<8x512xf32>
      %24 = vector.shape_cast %23 : vector<8x512xf32> to vector<1x8x512xf32>
      %c0_18 = arith.constant 0 : index
      %c0_19 = arith.constant 0 : index
      %c0_20 = arith.constant 0 : index
      %25 = vector.load %arg6[%c0_18, %c0_19, %c0_20] : memref<1x8x512xf32, #tpu.memory_space<vmem>>, vector<1x8x512xf32>
      tpu.vector_store %arg6[%c0_18, %c0_19, %c0_20], %24 {strides = array<i32>} : memref<1x8x512xf32, #tpu.memory_space<vmem>>, vector<1x8x512xf32>,
    } else {
    }
    return
  }
  func.func @transform_0(%arg0: i32, %arg1: i32, %arg2: i32) -> (i32, i32) {
    %c0_i32 = arith.constant 0 : i32
    return %arg0, %arg2 : i32, i32
  }
  func.func @transform_1(%arg0: i32, %arg1: i32, %arg2: i32) -> (i32, i32) {
    %c0_i32 = arith.constant 0 : i32
    return %arg2, %arg1 : i32, i32
  }
  func.func @transform_2(%arg0: i32, %arg1: i32, %arg2: i32) -> (i32, i32) {
    %c0_i32 = arith.constant 0 : i32
    return %arg0, %arg1 : i32, i32
  }
  func.func @transform_3(%arg0: i32, %arg1: i32, %arg2: i32) -> (i32, i32, i32) {
    %c0_i32 = arith.constant 0 : i32
    %c0_i32_0 = arith.constant 0 : i32
    return %arg0, %c0_i32, %arg1 : i32, i32, i32
  }
}

module attributes {stable_mosaic.version = 11 : i64} {
  func.func @kern2(%arg0: i32, %arg1: i32, %arg2: memref<8x512xbf16, #tpu.memory_space<vmem>>, %arg3: memref<8x512xbf16, #tpu.memory_space<vmem>>, %arg4: memref<1x512xf32, #tpu.memory_space<vmem>>, %arg5: memref<1x512xf32, #tpu.memory_space<vmem>>, %arg6: memref<512x128xbf16, #tpu.memory_space<vmem>>, %arg7: memref<1x128xf32, #tpu.memory_space<vmem>>, %arg8: memref<8x128xf32, #tpu.memory_space<vmem>>, %arg9: memref<8x128xf32, #tpu.memory_space<vmem>>) attributes {dimension_semantics = [#tpu.dimension_semantics<parallel>, #tpu.dimension_semantics<arbitrary>], iteration_bounds = array<i64: 1, 1>, scalar_prefetch = 0 : i64, scratch_operands = 1 : i64, tpu.core_type = #tpu.core_type<tc>, window_params = [{transform_indices = @transform_0, window_bounds = array<i64: 8, 512>}, {transform_indices = @transform_1, window_bounds = array<i64: 8, 512>}, {transform_indices = @transform_2, window_bounds = array<i64: 1, 512>}, {transform_indices = @transform_3, window_bounds = array<i64: 1, 512>}, {transform_indices = @transform_4, window_bounds = array<i64: 512, 128>}, {pipeline_mode = #tpu.pipeline_mode<synchronous>, transform_indices = @transform_5, window_bounds = array<i64: 1, 128>}, {transform_indices = @transform_6, window_bounds = array<i64: 8, 128>}]} {
    %c0_i32 = arith.constant 0 : i32
    %0 = arith.cmpi eq, %arg1, %c0_i32 : i32
    %1 = arith.extui %0 : i1 to i32
    %c0_i32_0 = arith.constant 0 : i32
    %2 = arith.cmpi ne, %1, %c0_i32_0 : i32
    scf.if %2 {
      %cst_17 = arith.constant 0.000000e+00 : f32
      %25 = vector.broadcast %cst_17 : f32 to vector<8x128xf32>
      %c0_18 = arith.constant 0 : index
      %c0_19 = arith.constant 0 : index
      %26 = vector.load %arg9[%c0_18, %c0_19] : memref<8x128xf32, #tpu.memory_space<vmem>>, vector<8x128xf32>
      tpu.vector_store %arg9[%c0_18, %c0_19], %25 {strides = array<i32>} : memref<8x128xf32, #tpu.memory_space<vmem>>, vector<8x128xf32>,
    } else {
    }
    %c0 = arith.constant 0 : index
    %c0_1 = arith.constant 0 : index
    %3 = vector.load %arg2[%c0, %c0_1] : memref<8x512xbf16, #tpu.memory_space<vmem>>, vector<8x512xbf16>
    %4 = arith.extf %3 : vector<8x512xbf16> to vector<8x512xf32>
    %c0_2 = arith.constant 0 : index
    %c0_3 = arith.constant 0 : index
    %5 = vector.load %arg4[%c0_2, %c0_3] : memref<1x512xf32, #tpu.memory_space<vmem>>, vector<1x512xf32>
    %6 = vector.broadcast %5 : vector<1x512xf32> to vector<8x512xf32>
    %7 = arith.mulf %4, %6 : vector<8x512xf32>
    %c0_4 = arith.constant 0 : index
    %c0_5 = arith.constant 0 : index
    %8 = vector.load %arg5[%c0_4, %c0_5] : memref<1x512xf32, #tpu.memory_space<vmem>>, vector<1x512xf32>
    %9 = vector.broadcast %8 : vector<1x512xf32> to vector<8x512xf32>
    %10 = arith.addf %7, %9 : vector<8x512xf32>
    %cst = arith.constant 0.000000e+00 : f32
    %11 = vector.broadcast %cst : f32 to vector<8x512xf32>
    %12 = arith.maximumf %10, %11 : vector<8x512xf32>
    %c0_6 = arith.constant 0 : index
    %c0_7 = arith.constant 0 : index
    %13 = vector.load %arg3[%c0_6, %c0_7] : memref<8x512xbf16, #tpu.memory_space<vmem>>, vector<8x512xbf16>
    %14 = arith.extf %13 : vector<8x512xbf16> to vector<8x512xf32>
    %15 = arith.mulf %12, %14 : vector<8x512xf32>
    %c0_8 = arith.constant 0 : index
    %c0_9 = arith.constant 0 : index
    %16 = vector.load %arg9[%c0_8, %c0_9] : memref<8x128xf32, #tpu.memory_space<vmem>>, vector<8x128xf32>
    %17 = arith.truncf %15 : vector<8x512xf32> to vector<8x512xbf16>
    %c0_10 = arith.constant 0 : index
    %c0_11 = arith.constant 0 : index
    %18 = vector.load %arg6[%c0_10, %c0_11] : memref<512x128xbf16, #tpu.memory_space<vmem>>, vector<512x128xbf16>
    %cst_12 = arith.constant dense<0.000000e+00> : vector<8x128xf32>
    %19 = tpu.matmul %17, %18, %cst_12 {dimension_numbers = #tpu.dot_dimension_numbers<[1], [0], [0], [1], [0, 0, 1, 1], [], []>} : vector<8x512xbf16>, vector<512x128xbf16>, vector<8x128xf32> -> vector<8x128xf32>
    %20 = arith.addf %16, %19 : vector<8x128xf32>
    %c0_13 = arith.constant 0 : index
    %c0_14 = arith.constant 0 : index
    %21 = vector.load %arg9[%c0_13, %c0_14] : memref<8x128xf32, #tpu.memory_space<vmem>>, vector<8x128xf32>
    tpu.vector_store %arg9[%c0_13, %c0_14], %20 {strides = array<i32>} : memref<8x128xf32, #tpu.memory_space<vmem>>, vector<8x128xf32>,
    %c0_i32_15 = arith.constant 0 : i32
    %22 = arith.cmpi eq, %arg1, %c0_i32_15 : i32
    %23 = arith.extui %22 : i1 to i32
    %c0_i32_16 = arith.constant 0 : i32
    %24 = arith.cmpi ne, %23, %c0_i32_16 : i32
    scf.if %24 {
      %c0_17 = arith.constant 0 : index
      %c0_18 = arith.constant 0 : index
      %25 = vector.load %arg9[%c0_17, %c0_18] : memref<8x128xf32, #tpu.memory_space<vmem>>, vector<8x128xf32>
      %cst_19 = arith.constant 1.42857146 : f32
      %26 = vector.broadcast %cst_19 : f32 to vector<8x128xf32>
      %27 = arith.mulf %25, %26 : vector<8x128xf32>
      %c0_20 = arith.constant 0 : index
      %c0_21 = arith.constant 0 : index
      %28 = vector.load %arg7[%c0_20, %c0_21] : memref<1x128xf32, #tpu.memory_space<vmem>>, vector<1x128xf32>
      %29 = vector.broadcast %28 : vector<1x128xf32> to vector<8x128xf32>
      %30 = arith.addf %27, %29 : vector<8x128xf32>
      %c0_22 = arith.constant 0 : index
      %c0_23 = arith.constant 0 : index
      %31 = vector.load %arg8[%c0_22, %c0_23] : memref<8x128xf32, #tpu.memory_space<vmem>>, vector<8x128xf32>
      tpu.vector_store %arg8[%c0_22, %c0_23], %30 {strides = array<i32>} : memref<8x128xf32, #tpu.memory_space<vmem>>, vector<8x128xf32>,
    } else {
    }
    return
  }
  func.func @transform_0(%arg0: i32, %arg1: i32) -> (i32, i32) {
    %c0_i32 = arith.constant 0 : i32
    return %arg0, %arg1 : i32, i32
  }
  func.func @transform_1(%arg0: i32, %arg1: i32) -> (i32, i32) {
    %c0_i32 = arith.constant 0 : i32
    return %arg0, %arg1 : i32, i32
  }
  func.func @transform_2(%arg0: i32, %arg1: i32) -> (i32, i32) {
    %c0_i32 = arith.constant 0 : i32
    %c0_i32_0 = arith.constant 0 : i32
    return %c0_i32, %arg1 : i32, i32
  }
  func.func @transform_3(%arg0: i32, %arg1: i32) -> (i32, i32) {
    %c0_i32 = arith.constant 0 : i32
    %c0_i32_0 = arith.constant 0 : i32
    return %c0_i32, %arg1 : i32, i32
  }
  func.func @transform_4(%arg0: i32, %arg1: i32) -> (i32, i32) {
    %c0_i32 = arith.constant 0 : i32
    %c0_i32_0 = arith.constant 0 : i32
    return %arg1, %c0_i32 : i32, i32
  }
  func.func @transform_5(%arg0: i32, %arg1: i32) -> (i32, i32) {
    %c0_i32 = arith.constant 0 : i32
    %c0_i32_0 = arith.constant 0 : i32
    %c0_i32_1 = arith.constant 0 : i32
    return %c0_i32, %c0_i32_0 : i32, i32
  }
  func.func @transform_6(%arg0: i32, %arg1: i32) -> (i32, i32) {
    %c0_i32 = arith.constant 0 : i32
    %c0_i32_0 = arith.constant 0 : i32
    return %arg0, %c0_i32 : i32, i32
  }
}

</mosaic_0001>

<bundles_post_ra>
// kernel: mul.3
= control target key start
LH: loop header
LB: loop body
LE: loop exit
PB: predicated region body
PF: predicated region fallthrough
CT: control target
= control target key end

     0   :  { %s100_s0 = inlined_call_operand.vmem [shape: f32[1,512], index: 0, kind: input, shape index: {}]   ;;  %s101_s1 = inlined_call_operand.vmem [shape: f32[1,512], index: 1, kind: input, shape index: {}]   ;;  %s102_s2 = inlined_call_operand.vmem [shape: f32[1,512], index: 2, kind: output, shape index: {}]  }
   0x1   :  { %v3_v0 = vld [vmem:[%s100_s0] sm:$0x1]  ;;  %v40_v2 = vld [vmem:[%s100_s0 + $0x1] sm:$0x1]  ;;  %v43_v5 = vld [vmem:[%s100_s0 + $0x2] sm:$0x1] }
   0x2   :  { %v4_v1 = vld [vmem:[%s101_s1] sm:$0x1]  ;;  %v41_v4 = vld [vmem:[%s101_s1 + $0x1] sm:$0x1]  ;;  %v44_v6 = vld [vmem:[%s101_s1 + $0x2] sm:$0x1] }
   0x3   :  { %v7_v3 = vmul.f32 %v4_v1, %v3_v0  ;;  %v16_v7 = vmul.f32 %v41_v4, %v40_v2  ;;  %v26_v8 = vmul.f32 %v44_v6, %v43_v5  ;;  %v46_v9 = vld [vmem:[%s100_s0 + $0x3] sm:$0x1] }
   0x4   :  { %v47_v10 = vld [vmem:[%s101_s1 + $0x3] sm:$0x1] }
   0x5   :  { %9 = vst [vmem:[%s102_s2] sm:$0x1] %v7_v3  ;;  %v36_v11 = vmul.f32 %v47_v10, %v46_v9  ;;  %42 = vst [vmem:[%s102_s2 + $0x1] sm:$0x1] %v16_v7 }
   0x6   :  { %45 = vst [vmem:[%s102_s2 + $0x2] sm:$0x1] %v26_v8 }
   0x7   :  { %48 = vst [vmem:[%s102_s2 + $0x3] sm:$0x1] %v36_v11 }

// kernel: fwd.3
= control target key start
LH: loop header
LB: loop body
LE: loop exit
PB: predicated region body
PF: predicated region fallthrough
CT: control target
= control target key end

     0   :  { %v37_v22 = vlaneseq  ;;  %s726_s4 = inlined_call_operand.vmem [shape: bf16[512,128], index: 4, kind: input, shape index: {}]   ;;  %s727_s0 = inlined_call_operand.vmem [shape: bf16[8,512], index: 0, kind: input, shape index: {}]   ;;  %s728_s2 = inlined_call_operand.vmem [shape: f32[1,512], index: 2, kind: input, shape index: {}]   ;;  %s729_s3 = inlined_call_operand.vmem [shape: f32[1,512], index: 3, kind: input, shape index: {}]   ;;  %s730_s1 = inlined_call_operand.vmem [shape: bf16[8,512], index: 1, kind: input, shape index: {}]   ;;  %s731_s5 = inlined_call_operand.vmem [shape: f32[1,128], index: 5, kind: input, shape index: {}]   ;;  %s732_s6 = inlined_call_operand.vmem [shape: f32[8,128], index: 6, kind: output, shape index: {}]  }
   0x1   :  { %v539_v0 = vld [vmem:[%s726_s4 + $0x40] sm:$0xff]   ;;  %v543_v4 = vld [vmem:[%s726_s4 + $0x48] sm:$0xff]   ;;  %v547_v8 = vld [vmem:[%s726_s4 + $0x50] sm:$0xff]  }
   0x2   :  { %v540_v1 = vld [vmem:[%s726_s4 + $0xc0] sm:$0xff]   ;;  %495 = vmatprep.subr.bf16.mxu0 %v539_v0  ;;  %v544_v5 = vld [vmem:[%s726_s4 + $0xc8] sm:$0xff]   ;;  %v548_v9 = vld [vmem:[%s726_s4 + $0xd0] sm:$0xff]   ;;  %v38_v27 = vshrl.u32 %v37_v22, 7 }
   0x3   :  { %v541_v2 = vld [vmem:[%s726_s4] sm:$0xff]   ;;  %517 = vmatprep.subr.bf16.mxu1 %v540_v1  ;;  %v545_v6 = vld [vmem:[%s726_s4 + $0x8] sm:$0xff]   ;;  %v549_v10 = vld [vmem:[%s726_s4 + $0x10] sm:$0xff]  }
   0x4   :  { %v542_v3 = vld [vmem:[%s726_s4 + $0x80] sm:$0xff]   ;;  %496 = vmatpush3.bf16.msra.mxu0 %v541_v2  ;;  %v546_v7 = vld [vmem:[%s726_s4 + $0x88] sm:$0xff]   ;;  %v550_v11 = vld [vmem:[%s726_s4 + $0x90] sm:$0xff]   ;;  %v43_v32 = vsub.s32 1, %v38_v27  ;;  %v51_v34 = vsub.s32 3, %v38_v27  ;;  %v39_v36 = vsub.s32 0, %v38_v27 }
   0x5   :  { %518 = vmatpush3.bf16.msra.mxu1 %v542_v3  ;;  %497 = vmatprep.subr.bf16.mxu0 %v543_v4  ;;  %v551_v12 = vld [vmem:[%s726_s4 + $0x58] sm:$0xff]   ;;  %v555_v16 = vld [vmem:[%s726_s4 + $0x60] sm:$0xff]   ;;  %v559_v20 = vld [vmem:[%s726_s4 + $0x68] sm:$0xff]   ;;  %v47_v40 = vsub.s32 2, %v38_v27 }
   0x6   :  { %519 = vmatprep.subr.bf16.mxu1 %v544_v5  ;;  %v552_v13 = vld [vmem:[%s726_s4 + $0xd8] sm:$0xff]   ;;  %v556_v17 = vld [vmem:[%s726_s4 + $0xe0] sm:$0xff]   ;;  %v560_v21 = vld [vmem:[%s726_s4 + $0xe8] sm:$0xff]  }
   0x7   :  { %v553_v14 = vld [vmem:[%s726_s4 + $0x18] sm:$0xff]   ;;  %v557_v18 = vld [vmem:[%s726_s4 + $0x20] sm:$0xff]   ;;  %v561_v23 = vld [vmem:[%s726_s4 + $0x28] sm:$0xff]  }
   0x8   :  { %498 = vmatpush3.bf16.msra.mxu0 %v545_v6  ;;  %v554_v15 = vld [vmem:[%s726_s4 + $0x98] sm:$0xff]   ;;  %v558_v19 = vld [vmem:[%s726_s4 + $0xa0] sm:$0xff]   ;;  %v562_v24 = vld [vmem:[%s726_s4 + $0xa8] sm:$0xff]  }
   0x9   :  { %520 = vmatpush3.bf16.msra.mxu1 %v546_v7  ;;  %499 = vmatprep.subr.bf16.mxu0 %v547_v8  ;;  %v563_v25 = vld [vmem:[%s726_s4 + $0x70] sm:$0xff]   ;;  %v567_v30 = vld [vmem:[%s726_s4 + $0x78] sm:$0xff]   ;;  %v29_v37 = vld [vmem:[%s727_s0] sm:$0xff] }
   0xa   :  { %521 = vmatprep.subr.bf16.mxu1 %v548_v9  ;;  %v564_v26 = vld [vmem:[%s726_s4 + $0xf0] sm:$0xff]   ;;  %v568_v31 = vld [vmem:[%s726_s4 + $0xf8] sm:$0xff]   ;;  %v35_v38 = vld [vmem:[%s728_s2] sm:$0xf]  ;;  %v32_v41 = vunpack.c.h.bf16 %v29_v37  ;;  %v31_v45 = vunpack.c.l.bf16 %v29_v37 }
   0xb   :  { %v565_v28 = vld [vmem:[%s726_s4 + $0x30] sm:$0xff]   ;;  %v569_v33 = vld [vmem:[%s726_s4 + $0x38] sm:$0xff]   ;;  %v61_v39 = vld [vmem:[%s729_s3] sm:$0xf]  ;;  %v44_v42 = vrot.slane %v35_v38, %v43_v32  ;;  %v52_v50 = vrot.slane %v35_v38, %v51_v34  ;;  %v40_v53 = vrot.slane %v35_v38, %v39_v36  ;;  %v48_v55 = vrot.slane %v35_v38, %v47_v40 }
   0xc   :  { %500 = vmatpush3.bf16.msra.mxu0 %v549_v10  ;;  %v566_v29 = vld [vmem:[%s726_s4 + $0xb0] sm:$0xff]   ;;  %v570_v35 = vld [vmem:[%s726_s4 + $0xb8] sm:$0xff]   ;;  %v70_v43 = vrot.slane %v61_v39, %v43_v32  ;;  %v30_v44 = vld [vmem:[%s727_s0 + $0x8] sm:$0xff]  ;;  %v78_v51 = vrot.slane %v61_v39, %v51_v34  ;;  %v66_v54 = vrot.slane %v61_v39, %v39_v36  ;;  %v74_v59 = vrot.slane %v61_v39, %v47_v40 }
   0xd   :  { %522 = vmatpush3.bf16.msra.mxu1 %v550_v11  ;;  %501 = vmatprep.subr.bf16.mxu0 %v551_v12  ;;  %v91_v46 = vld [vmem:[%s730_s1] sm:$0xff]  ;;  %v33_v47 = vunpack.c.l.bf16 %v30_v44  ;;  %v34_v48 = vunpack.c.h.bf16 %v30_v44  ;;  %v58_v49 = vmul.f32 %v44_v42, %v32_v41  ;;  %v92_v52 = vld [vmem:[%s730_s1 + $0x8] sm:$0xff]  ;;  %v57_v60 = vmul.f32 %v40_v53, %v31_v45 }
   0xe   :  { %523 = vmatprep.subr.bf16.mxu1 %v552_v13  ;;  %v94_v57 = vunpack.c.h.bf16 %v91_v46  ;;  %v96_v0 = vunpack.c.h.bf16 %v92_v52  ;;  %v93_v1 = vunpack.c.l.bf16 %v91_v46  ;;  %v95_v2 = vunpack.c.l.bf16 %v92_v52  ;;  %v494_v27 = vld [vmem:[%s731_s5] ss:$0 sm:$0xff] }
   0xf   :  { %v84_v56 = vadd.f32 %v70_v43, %v58_v49  ;;  %v60_v58 = vmul.f32 %v52_v50, %v34_v48  ;;  %v59_v61 = vmul.f32 %v48_v55, %v33_v47  ;;  %v83_v3 = vadd.f32 %v66_v54, %v57_v60 }
  0x10   :  { %502 = vmatpush3.bf16.msra.mxu0 %v553_v14 }
  0x11   :  { %524 = vmatpush3.bf16.msra.mxu1 %v554_v15  ;;  %503 = vmatprep.subr.bf16.mxu0 %v555_v16  ;;  %v88_v62 = vmax.f32 %v84_v56, 0.0  ;;  %v86_v63 = vadd.f32 %v78_v51, %v60_v58  ;;  %v85_v4 = vadd.f32 %v74_v59, %v59_v61  ;;  %v87_v7 = vmax.f32 %v83_v3, 0.0 }
  0x12   :  { %525 = vmatprep.subr.bf16.mxu1 %v556_v17 }
  0x13   :  { %v98_v5 = vmul.f32 %v94_v57, %v88_v62  ;;  %v90_v6 = vmax.f32 %v86_v63, 0.0  ;;  %v89_v8 = vmax.f32 %v85_v4, 0.0  ;;  %v97_v11 = vmul.f32 %v93_v1, %v87_v7 }
  0x14   :  { %504 = vmatpush3.bf16.msra.mxu0 %v557_v18 }
  0x15   :  { %526 = vmatpush3.bf16.msra.mxu1 %v558_v19  ;;  %505 = vmatprep.subr.bf16.mxu0 %v559_v20  ;;  %v103_v9 = vpack.c.bf16 %v98_v5, %v98_v5  ;;  %v100_v10 = vmul.f32 %v96_v0, %v90_v6  ;;  %v99_v12 = vmul.f32 %v95_v2, %v89_v8 }
  0x16   :  { %527 = vmatprep.subr.bf16.mxu1 %v560_v21  ;;  %v102_v14 = vpack.c.bf16 %v97_v11, %v97_v11 }
  0x17   :  { %394 = vmatprep.mubr.bf16.mxu0 %v103_v9  ;;  %v105_v13 = vpack.c.bf16 %v100_v10, %v100_v10  ;;  %v104_v15 = vpack.c.bf16 %v99_v12, %v99_v12 }
  0x18   :  { %506 = vmatpush3.bf16.msra.mxu0 %v561_v23 }
  0x19   :  { %528 = vmatpush3.bf16.msra.mxu1 %v562_v24  ;;  %507 = vmatprep.subr.bf16.mxu0 %v563_v25 }
  0x1a   :  { %529 = vmatprep.subr.bf16.mxu1 %v564_v26  ;;  %434 = vmatprep.mubr.bf16.mxu1 %v105_v13 }
  0x1c   :  { %508 = vmatpush3.bf16.msra.mxu0 %v565_v28 }
  0x1d   :  { %530 = vmatpush3.bf16.msra.mxu1 %v566_v29  ;;  %509 = vmatprep.subr.bf16.mxu0 %v567_v30 }
  0x1e   :  { %531 = vmatprep.subr.bf16.mxu1 %v568_v31 }
  0x20   :  { %510 = vmatpush3.bf16.msra.mxu0 %v569_v33 }
  0x21   :  { %532 = vmatpush3.bf16.msra.mxu1 %v570_v35 }
  0x23   :  { %395 = vmatmul.mubr.bf16.vlgmr.msra.gmra.mrb[0].mxu0 %v102_v14 }
  0x24   :  { %435 = vmatmul.mubr.bf16.vlgmr.msra.gmra.mrb[0].mxu1 %v104_v15 }
  0xf6   :  { %v511_v16 = vpop.f32.mrb[0].mxu0 }
  0xf7   :  { %v533_v17 = vpop.f32.mrb[0].mxu1  ;;  %v512_v18 = vpop.f32.mrb[1].mxu0 }
  0xf8   :  { %v534_v19 = vpop.f32.mrb[1].mxu1  ;;  %v513_v20 = vadd.f32 %v512_v18, %v511_v16  ;;  %v514_v22 = vpop.f32.mrb[2].mxu0 }
  0xf9   :  { %v535_v21 = vadd.f32 %v534_v19, %v533_v17  ;;  %v536_v23 = vpop.f32.mrb[2].mxu1  ;;  %v515_v24 = vpop.f32.mrb[3].mxu0 }
  0xfa   :  { %v537_v25 = vpop.f32.mrb[3].mxu1 }
  0xfb   :  { %v437_v26 = vadd.f32 %v535_v21, %v513_v20 }
  0xfd   :  { %v448_v28 = vmul.f32 1.4285715, %v437_v26 }
  0xff   :  { %v456_v29 = vadd.f32 %v494_v27, %v448_v28 }
 0x101   :  { %457 = vst [vmem:[%s732_s6] sm:$0xff] %v456_v29 }

// kernel: fwd.2
= control target key start
LH: loop header
LB: loop body
LE: loop exit
PB: predicated region body
PF: predicated region fallthrough
CT: control target
= control target key end

     0   :  { %9 = vsyncpa [#allocation4], 0  ;;  %s2758_s12 = smov [#allocation3]   ;;  %s2849_s0 = inlined_call_operand.vmem [shape: bf16[8,1024], index: 0, kind: input, shape index: {}]   ;;  %s2850_s1 = inlined_call_operand.hbm [shape: bf16[1024,512], index: 1, kind: input, shape index: {}]   ;;  %s2851_s2 = inlined_call_operand.vmem [shape: bf16[8,512], index: 2, kind: output, shape index: {0}]   ;;  %s2852_s3 = inlined_call_operand.vmem [shape: f32[1,8,512], index: 3, kind: output, shape index: {1}]  }
   0x1   :  { %s17_s13 = sshll.u32 %s2758_s12, 4  ;;  %s2734_s16 = scalar_lea.hbm %s2850_s1, 32768  ;;  %s18_s13 = int_to_ptr.vmem [resolvable:$true] %s17_s13 }
   0x2   :  { %p2735_p0 = scmp.ne.s32.totalorder %s2850_s1, %s2734_s16  ;;  %p2738_p1 = scmp.lt.u32.totalorder %s2734_s16, %s2850_s1 }
   0x4   :  { %p2740_p2 = pnand %p2738_p1, %p2735_p0 }
   0x6   :  { %2743 = shalt.err (!%p2740_p2)
}
   0x7   :  { %s2744_s21 = scalar_lea.vmem %s18_s13, 32768  ;;  %p2749_p4 = scmp.lt.s32.totalorder %s18_s13, %s18_s13 }
   0x8   :  { %p2745_p3 = scmp.ne.s32.totalorder %s18_s13, %s2744_s21  ;;  %p2750_p5 = scmp.lt.s32.totalorder %s2744_s21, %s2744_s21 }
   0xa   :  { %p2751_p6 = por %p2750_p5, %p2749_p4 }
   0xc   :  { %p2752_p7 = pnand %p2751_p6, %p2745_p3 }
   0xe   :  { %2755 = shalt.err (!%p2752_p7)
}
   0xf   :  { %s2759_s22 = smov 256   ;;  %s2760_s23 = smov 16  }
  0x10   :  { %23 = dma.hbm_to_vmem [thread:$0]  %s2850_s1, 32768, %s18_s13, [#allocation4], %s2759_s22, %s2759_s22, %s2760_s23  }
  0x11   :  { %2756 = dma.done.wait [#allocation4], 32768  }
  0x12   :  { %2757 = vsyncadd [#allocation4], 4294934528  ;;  %v2342_v0 = vld [vmem:[#allocation3 + $0x4] ss:$16 sps:$4 sm:$0xff]   ;;  %v2344_v1 = vld [vmem:[#allocation3 + $0xc] ss:$16 sps:$4 sm:$0xff]  }
  0x13   :  { %1607 = vmatprep.subr.bf16.mxu0 %v2342_v0  ;;  %v2346_v2 = vld [vmem:[#allocation3] ss:$16 sps:$4 sm:$0xff]   ;;  %v2347_v3 = vld [vmem:[#allocation3 + $0x8] ss:$16 sps:$4 sm:$0xff]   ;;  %1771 = vmatprep.subr.bf16.mxu1 %v2344_v1  ;;  %v2348_v4 = vld [vmem:[#allocation3 + $0x24] ss:$16 sps:$4 sm:$0xff]  }
  0x14   :  { %1608 = vmatpush1.bf16.msra.mxu0 %v2346_v2  ;;  %1772 = vmatpush1.bf16.msra.mxu1 %v2347_v3  ;;  %v2350_v5 = vld [vmem:[#allocation3 + $0x2c] ss:$16 sps:$4 sm:$0xff]   ;;  %v2352_v6 = vld [vmem:[#allocation3 + $0x20] ss:$16 sps:$4 sm:$0xff]   ;;  %v2353_v7 = vld [vmem:[#allocation3 + $0x28] ss:$16 sps:$4 sm:$0xff]  }
  0x15   :  { %1609 = vmatprep.subr.bf16.mxu0 %v2348_v4  ;;  %1773 = vmatprep.subr.bf16.mxu1 %v2350_v5  ;;  %v2354_v8 = vld [vmem:[#allocation3 + $0x44] ss:$16 sps:$4 sm:$0xff]   ;;  %v2356_v9 = vld [vmem:[#allocation3 + $0x4c] ss:$16 sps:$4 sm:$0xff]   ;;  %v2358_v10 = vld [vmem:[#allocation3 + $0x40] ss:$16 sps:$4 sm:$0xff]  }
  0x16   :  { %v2359_v11 = vld [vmem:[#allocation3 + $0x48] ss:$16 sps:$4 sm:$0xff]   ;;  %v2360_v12 = vld [vmem:[#allocation3 + $0x64] ss:$16 sps:$4 sm:$0xff]   ;;  %v2362_v13 = vld [vmem:[#allocation3 + $0x6c] ss:$16 sps:$4 sm:$0xff]  }
  0x17   :  { %v2364_v14 = vld [vmem:[#allocation3 + $0x60] ss:$16 sps:$4 sm:$0xff]   ;;  %v2365_v15 = vld [vmem:[#allocation3 + $0x68] ss:$16 sps:$4 sm:$0xff]   ;;  %v2366_v16 = vld [vmem:[#allocation3 + $0x84] ss:$16 sps:$4 sm:$0xff]  }
  0x18   :  { %1610 = vmatpush1.bf16.msra.mxu0 %v2352_v6  ;;  %1774 = vmatpush1.bf16.msra.mxu1 %v2353_v7  ;;  %v2368_v17 = vld [vmem:[#allocation3 + $0x8c] ss:$16 sps:$4 sm:$0xff]   ;;  %v2370_v18 = vld [vmem:[#allocation3 + $0x80] ss:$16 sps:$4 sm:$0xff]   ;;  %v2371_v19 = vld [vmem:[#allocation3 + $0x88] ss:$16 sps:$4 sm:$0xff]  }
  0x19   :  { %1611 = vmatprep.subr.bf16.mxu0 %v2354_v8  ;;  %1775 = vmatprep.subr.bf16.mxu1 %v2356_v9  ;;  %v2372_v20 = vld [vmem:[#allocation3 + $0xa4] ss:$16 sps:$4 sm:$0xff]   ;;  %v2374_v21 = vld [vmem:[#allocation3 + $0xac] ss:$16 sps:$4 sm:$0xff]   ;;  %v2376_v22 = vld [vmem:[#allocation3 + $0xa0] ss:$16 sps:$4 sm:$0xff]  }
  0x1a   :  { %v2377_v23 = vld [vmem:[#allocation3 + $0xa8] ss:$16 sps:$4 sm:$0xff]   ;;  %v2378_v24 = vld [vmem:[#allocation3 + $0xc4] ss:$16 sps:$4 sm:$0xff]   ;;  %v2380_v25 = vld [vmem:[#allocation3 + $0xcc] ss:$16 sps:$4 sm:$0xff]  }
  0x1b   :  { %v2382_v26 = vld [vmem:[#allocation3 + $0xc0] ss:$16 sps:$4 sm:$0xff]   ;;  %v2383_v27 = vld [vmem:[#allocation3 + $0xc8] ss:$16 sps:$4 sm:$0xff]   ;;  %v2384_v28 = vld [vmem:[#allocation3 + $0xe4] ss:$16 sps:$4 sm:$0xff]  }
  0x1c   :  { %1612 = vmatpush1.bf16.msra.mxu0 %v2358_v10  ;;  %1776 = vmatpush1.bf16.msra.mxu1 %v2359_v11  ;;  %v2386_v29 = vld [vmem:[#allocation3 + $0xec] ss:$16 sps:$4 sm:$0xff]   ;;  %v2388_v30 = vld [vmem:[#allocation3 + $0xe0] ss:$16 sps:$4 sm:$0xff]   ;;  %v2389_v31 = vld [vmem:[#allocation3 + $0xe8] ss:$16 sps:$4 sm:$0xff]  }
  0x1d   :  { %1613 = vmatprep.subr.bf16.mxu0 %v2360_v12  ;;  %1777 = vmatprep.subr.bf16.mxu1 %v2362_v13  ;;  %v2390_v32 = vld [vmem:[#allocation3 + $0x104] ss:$16 sps:$4 sm:$0xff]   ;;  %v2392_v33 = vld [vmem:[#allocation3 + $0x10c] ss:$16 sps:$4 sm:$0xff]   ;;  %v2394_v34 = vld [vmem:[#allocation3 + $0x100] ss:$16 sps:$4 sm:$0xff]  }
  0x1e   :  { %v2395_v35 = vld [vmem:[#allocation3 + $0x108] ss:$16 sps:$4 sm:$0xff]   ;;  %v2396_v36 = vld [vmem:[#allocation3 + $0x124] ss:$16 sps:$4 sm:$0xff]   ;;  %v2398_v37 = vld [vmem:[#allocation3 + $0x12c] ss:$16 sps:$4 sm:$0xff]  }
  0x1f   :  { %v2400_v38 = vld [vmem:[#allocation3 + $0x120] ss:$16 sps:$4 sm:$0xff]   ;;  %v2401_v39 = vld [vmem:[#allocation3 + $0x128] ss:$16 sps:$4 sm:$0xff]   ;;  %v2402_v40 = vld [vmem:[#allocation3 + $0x144] ss:$16 sps:$4 sm:$0xff]  }
  0x20   :  { %1614 = vmatpush1.bf16.msra.mxu0 %v2364_v14  ;;  %1778 = vmatpush1.bf16.msra.mxu1 %v2365_v15  ;;  %v2404_v41 = vld [vmem:[#allocation3 + $0x14c] ss:$16 sps:$4 sm:$0xff]   ;;  %v2406_v42 = vld [vmem:[#allocation3 + $0x140] ss:$16 sps:$4 sm:$0xff]   ;;  %v2407_v43 = vld [vmem:[#allocation3 + $0x148] ss:$16 sps:$4 sm:$0xff]  }
  0x21   :  { %1615 = vmatprep.subr.bf16.mxu0 %v2366_v16  ;;  %1779 = vmatprep.subr.bf16.mxu1 %v2368_v17  ;;  %v2408_v44 = vld [vmem:[#allocation3 + $0x164] ss:$16 sps:$4 sm:$0xff]   ;;  %v2410_v45 = vld [vmem:[#allocation3 + $0x16c] ss:$16 sps:$4 sm:$0xff]   ;;  %v2412_v47 = vld [vmem:[#allocation3 + $0x160] ss:$16 sps:$4 sm:$0xff]  }
  0x22   :  { %v39_v46 = vld [vmem:[%s2849_s0] sm:$0xff]  ;;  %v2413_v49 = vld [vmem:[#allocation3 + $0x168] ss:$16 sps:$4 sm:$0xff]   ;;  %v2416_v51 = vld [vmem:[#allocation3 + $0x18c] ss:$16 sps:$4 sm:$0xff]   ;;  %vm2024_vm0 = vcmask 1040384  }
  0x23   :  { %v2048_v48 = vcombine.high %v39_v46, %v39_v46  ;;  %v2414_v50 = vld [vmem:[#allocation3 + $0x184] ss:$16 sps:$4 sm:$0xff]   ;;  %v2418_v52 = vld [vmem:[#allocation3 + $0x180] ss:$16 sps:$4 sm:$0xff]   ;;  %v2419_v53 = vld [vmem:[#allocation3 + $0x188] ss:$16 sps:$4 sm:$0xff]   ;;  %v2047_v4 = vcombine.low %v39_v46, %v39_v46 }
  0x24   :  { %1616 = vmatpush1.bf16.msra.mxu0 %v2370_v18  ;;  %1780 = vmatpush1.bf16.msra.mxu1 %v2371_v19  ;;  %v2420_v54 = vld [vmem:[#allocation3 + $0x1a4] ss:$16 sps:$4 sm:$0xff]   ;;  %v2422_v55 = vld [vmem:[#allocation3 + $0x1ac] ss:$16 sps:$4 sm:$0xff]   ;;  %v2424_v56 = vld [vmem:[#allocation3 + $0x1a0] ss:$16 sps:$4 sm:$0xff]  }
  0x25   :  { %1617 = vmatprep.subr.bf16.mxu0 %v2372_v20  ;;  %1781 = vmatprep.subr.bf16.mxu1 %v2374_v21  ;;  %v2425_v57 = vld [vmem:[#allocation3 + $0x1a8] ss:$16 sps:$4 sm:$0xff]   ;;  %v2426_v58 = vld [vmem:[#allocation3 + $0x1c4] ss:$16 sps:$4 sm:$0xff]   ;;  %v2428_v59 = vld [vmem:[#allocation3 + $0x1cc] ss:$16 sps:$4 sm:$0xff]  }
  0x26   :  { %1639 = vmatprep.mubr.bf16.mxu0 %v2048_v48  ;;  %1803 = vmatprep.mubr.bf16.mxu1 %v2048_v48  ;;  %v2430_v60 = vld [vmem:[#allocation3 + $0x1c0] ss:$16 sps:$4 sm:$0xff]   ;;  %v2431_v61 = vld [vmem:[#allocation3 + $0x1c8] ss:$16 sps:$4 sm:$0xff]   ;;  %v2432_v62 = vld [vmem:[#allocation3 + $0x1e4] ss:$16 sps:$4 sm:$0xff]  }
  0x27   :  { %v2434_v63 = vld [vmem:[#allocation3 + $0x1ec] ss:$16 sps:$4 sm:$0xff]   ;;  %v2436_v0 = vld [vmem:[#allocation3 + $0x1e0] ss:$16 sps:$4 sm:$0xff]   ;;  %v2437_v1 = vld [vmem:[#allocation3 + $0x1e8] ss:$16 sps:$4 sm:$0xff]  }
  0x28   :  { %1618 = vmatpush1.bf16.msra.mxu0 %v2376_v22  ;;  %1782 = vmatpush1.bf16.msra.mxu1 %v2377_v23  ;;  %v2442_v2 = vld [vmem:[#allocation3 + $0x204] ss:$16 sps:$4 sm:$0xff]   ;;  %v2445_v3 = vld [vmem:[#allocation3 + $0x20c] ss:$16 sps:$4 sm:$0xff]   ;;  %v2440_v5 = vld [vmem:[#allocation3 + $0x200] ss:$16 sps:$4 sm:$0xff]  }
  0x29   :  { %1619 = vmatprep.subr.bf16.mxu0 %v2378_v24  ;;  %1783 = vmatprep.subr.bf16.mxu1 %v2380_v25  ;;  %v2443_v6 = vld [vmem:[#allocation3 + $0x208] ss:$16 sps:$4 sm:$0xff]   ;;  %v2448_v7 = vld [vmem:[#allocation3 + $0x224] ss:$16 sps:$4 sm:$0xff]   ;;  %v2451_v8 = vld [vmem:[#allocation3 + $0x22c] ss:$16 sps:$4 sm:$0xff]  }
  0x2a   :  { %v2446_v9 = vld [vmem:[#allocation3 + $0x220] ss:$16 sps:$4 sm:$0xff]   ;;  %v2449_v10 = vld [vmem:[#allocation3 + $0x228] ss:$16 sps:$4 sm:$0xff]   ;;  %v2454_v11 = vld [vmem:[#allocation3 + $0x244] ss:$16 sps:$4 sm:$0xff]  }
  0x2b   :  { %v2457_v12 = vld [vmem:[#allocation3 + $0x24c] ss:$16 sps:$4 sm:$0xff]   ;;  %v2452_v13 = vld [vmem:[#allocation3 + $0x240] ss:$16 sps:$4 sm:$0xff]   ;;  %v2455_v14 = vld [vmem:[#allocation3 + $0x248] ss:$16 sps:$4 sm:$0xff]  }
  0x2c   :  { %1620 = vmatpush1.bf16.msra.mxu0 %v2382_v26  ;;  %1784 = vmatpush1.bf16.msra.mxu1 %v2383_v27  ;;  %v2460_v15 = vld [vmem:[#allocation3 + $0x264] ss:$16 sps:$4 sm:$0xff]   ;;  %v2463_v16 = vld [vmem:[#allocation3 + $0x26c] ss:$16 sps:$4 sm:$0xff]   ;;  %v2458_v17 = vld [vmem:[#allocation3 + $0x260] ss:$16 sps:$4 sm:$0xff]  }
  0x2d   :  { %1621 = vmatprep.subr.bf16.mxu0 %v2384_v28  ;;  %1785 = vmatprep.subr.bf16.mxu1 %v2386_v29  ;;  %v2461_v18 = vld [vmem:[#allocation3 + $0x268] ss:$16 sps:$4 sm:$0xff]   ;;  %v2466_v19 = vld [vmem:[#allocation3 + $0x284] ss:$16 sps:$4 sm:$0xff]   ;;  %v2469_v20 = vld [vmem:[#allocation3 + $0x28c] ss:$16 sps:$4 sm:$0xff]  }
  0x2e   :  { %v2464_v21 = vld [vmem:[#allocation3 + $0x280] ss:$16 sps:$4 sm:$0xff]   ;;  %v2467_v22 = vld [vmem:[#allocation3 + $0x288] ss:$16 sps:$4 sm:$0xff]   ;;  %v2472_v23 = vld [vmem:[#allocation3 + $0x2a4] ss:$16 sps:$4 sm:$0xff]  }
  0x2f   :  { %v2475_v24 = vld [vmem:[#allocation3 + $0x2ac] ss:$16 sps:$4 sm:$0xff]   ;;  %v2470_v25 = vld [vmem:[#allocation3 + $0x2a0] ss:$16 sps:$4 sm:$0xff]   ;;  %v2473_v26 = vld [vmem:[#allocation3 + $0x2a8] ss:$16 sps:$4 sm:$0xff]  }
  0x30   :  { %1622 = vmatpush1.bf16.msra.mxu0 %v2388_v30  ;;  %1786 = vmatpush1.bf16.msra.mxu1 %v2389_v31  ;;  %v2478_v27 = vld [vmem:[#allocation3 + $0x2c4] ss:$16 sps:$4 sm:$0xff]   ;;  %v2481_v28 = vld [vmem:[#allocation3 + $0x2cc] ss:$16 sps:$4 sm:$0xff]   ;;  %v2476_v31 = vld [vmem:[#allocation3 + $0x2c0] ss:$16 sps:$4 sm:$0xff]  }
  0x31   :  { %1623 = vmatprep.subr.bf16.mxu0 %v2390_v32  ;;  %1787 = vmatprep.subr.bf16.mxu1 %v2392_v33  ;;  %v2799_v29 = vld [vmem:[%s2849_s0 + $0x8] sm:$0xff]  ;;  %v2484_v33 = vld [vmem:[#allocation3 + $0x2e4] ss:$16 sps:$4 sm:$0xff]   ;;  %vm2029_vm1 = vcmask 1041408  }
  0x32   :  { %v2050_v30 = vcombine.high %v2799_v29, %v2799_v29  ;;  %v2479_v32 = vld [vmem:[#allocation3 + $0x2c8] ss:$16 sps:$4 sm:$0xff]   ;;  %v2505_v46 = vld [vmem:[#allocation3 + $0x34c] ss:$16 sps:$4 sm:$0xff]  }
  0x33   :  { %v2503_v48 = vld [vmem:[#allocation3 + $0x348] ss:$16 sps:$4 sm:$0xff]  }
  0x34   :  { %1624 = vmatpush1.bf16.msra.mxu0 %v2394_v34  ;;  %1788 = vmatpush1.bf16.msra.mxu1 %v2395_v35  ;;  %v2487_v34 = vld [vmem:[#allocation3 + $0x2ec] ss:$16 sps:$4 sm:$0xff]   ;;  %v2482_v35 = vld [vmem:[#allocation3 + $0x2e0] ss:$16 sps:$4 sm:$0xff]  }
  0x35   :  { %1625 = vmatprep.subr.bf16.mxu0 %v2396_v36  ;;  %1789 = vmatprep.subr.bf16.mxu1 %v2398_v37  ;;  %v2485_v36 = vld [vmem:[#allocation3 + $0x2e8] ss:$16 sps:$4 sm:$0xff]   ;;  %v2490_v37 = vld [vmem:[#allocation3 + $0x304] ss:$16 sps:$4 sm:$0xff]  }
  0x38   :  { %1626 = vmatpush1.bf16.msra.mxu0 %v2400_v38  ;;  %1790 = vmatpush1.bf16.msra.mxu1 %v2401_v39  ;;  %v2493_v38 = vld [vmem:[#allocation3 + $0x30c] ss:$16 sps:$4 sm:$0xff]   ;;  %v2488_v39 = vld [vmem:[#allocation3 + $0x300] ss:$16 sps:$4 sm:$0xff]  }
  0x39   :  { %1627 = vmatprep.subr.bf16.mxu0 %v2402_v40  ;;  %1791 = vmatprep.subr.bf16.mxu1 %v2404_v41  ;;  %v2491_v40 = vld [vmem:[#allocation3 + $0x308] ss:$16 sps:$4 sm:$0xff]   ;;  %v2496_v41 = vld [vmem:[#allocation3 + $0x324] ss:$16 sps:$4 sm:$0xff]  }
  0x3c   :  { %1628 = vmatpush1.bf16.msra.mxu0 %v2406_v42  ;;  %1792 = vmatpush1.bf16.msra.mxu1 %v2407_v43  ;;  %v2499_v42 = vld [vmem:[#allocation3 + $0x32c] ss:$16 sps:$4 sm:$0xff]   ;;  %v2494_v43 = vld [vmem:[#allocation3 + $0x320] ss:$16 sps:$4 sm:$0xff]  }
  0x3d   :  { %1629 = vmatprep.subr.bf16.mxu0 %v2408_v44  ;;  %1793 = vmatprep.subr.bf16.mxu1 %v2410_v45  ;;  %v2497_v44 = vld [vmem:[#allocation3 + $0x328] ss:$16 sps:$4 sm:$0xff]   ;;  %v2502_v45 = vld [vmem:[#allocation3 + $0x344] ss:$16 sps:$4 sm:$0xff]  }
  0x40   :  { %1630 = vmatpush1.bf16.msra.mxu0 %v2412_v47  ;;  %1794 = vmatpush1.bf16.msra.mxu1 %v2413_v49  ;;  %v2500_v47 = vld [vmem:[#allocation3 + $0x340] ss:$16 sps:$4 sm:$0xff]   ;;  %v2508_v49 = vld [vmem:[#allocation3 + $0x364] ss:$16 sps:$4 sm:$0xff]  }
  0x41   :  { %1631 = vmatprep.subr.bf16.mxu0 %v2414_v50  ;;  %1795 = vmatprep.subr.bf16.mxu1 %v2416_v51  ;;  %v2511_v50 = vld [vmem:[#allocation3 + $0x36c] ss:$16 sps:$4 sm:$0xff]   ;;  %v2506_v51 = vld [vmem:[#allocation3 + $0x360] ss:$16 sps:$4 sm:$0xff]  }
  0x44   :  { %1632 = vmatpush1.bf16.msra.mxu0 %v2418_v52  ;;  %1796 = vmatpush1.bf16.msra.mxu1 %v2419_v53  ;;  %v2509_v52 = vld [vmem:[#allocation3 + $0x368] ss:$16 sps:$4 sm:$0xff]   ;;  %v2514_v53 = vld [vmem:[#allocation3 + $0x384] ss:$16 sps:$4 sm:$0xff]  }
  0x45   :  { %1633 = vmatprep.subr.bf16.mxu0 %v2420_v54  ;;  %1797 = vmatprep.subr.bf16.mxu1 %v2422_v55  ;;  %v2517_v54 = vld [vmem:[#allocation3 + $0x38c] ss:$16 sps:$4 sm:$0xff]   ;;  %v2512_v55 = vld [vmem:[#allocation3 + $0x380] ss:$16 sps:$4 sm:$0xff]  }
  0x48   :  { %1634 = vmatpush1.bf16.msra.mxu0 %v2424_v56  ;;  %1798 = vmatpush1.bf16.msra.mxu1 %v2425_v57  ;;  %v2515_v56 = vld [vmem:[#allocation3 + $0x388] ss:$16 sps:$4 sm:$0xff]   ;;  %v2520_v57 = vld [vmem:[#allocation3 + $0x3a4] ss:$16 sps:$4 sm:$0xff]  }
  0x49   :  { %1635 = vmatprep.subr.bf16.mxu0 %v2426_v58  ;;  %1799 = vmatprep.subr.bf16.mxu1 %v2428_v59  ;;  %v2523_v58 = vld [vmem:[#allocation3 + $0x3ac] ss:$16 sps:$4 sm:$0xff]   ;;  %v2518_v59 = vld [vmem:[#allocation3 + $0x3a0] ss:$16 sps:$4 sm:$0xff]  }
  0x4c   :  { %1636 = vmatpush1.bf16.msra.mxu0 %v2430_v60  ;;  %1800 = vmatpush1.bf16.msra.mxu1 %v2431_v61  ;;  %v2521_v60 = vld [vmem:[#allocation3 + $0x3a8] ss:$16 sps:$4 sm:$0xff]   ;;  %v2526_v61 = vld [vmem:[#allocation3 + $0x3c4] ss:$16 sps:$4 sm:$0xff]  }
  0x4d   :  { %1637 = vmatprep.subr.bf16.mxu0 %v2432_v62  ;;  %1801 = vmatprep.subr.bf16.mxu1 %v2434_v63  ;;  %v2529_v62 = vld [vmem:[#allocation3 + $0x3cc] ss:$16 sps:$4 sm:$0xff]   ;;  %v2524_v63 = vld [vmem:[#allocation3 + $0x3c0] ss:$16 sps:$4 sm:$0xff]  }
  0x50   :  { %1638 = vmatpush1.bf16.msra.mxu0 %v2436_v0  ;;  %1802 = vmatpush1.bf16.msra.mxu1 %v2437_v1  ;;  %v2527_v0 = vld [vmem:[#allocation3 + $0x3c8] ss:$16 sps:$4 sm:$0xff]   ;;  %v2532_v1 = vld [vmem:[#allocation3 + $0x3e4] ss:$16 sps:$4 sm:$0xff]  }
  0x51   :  { %1648 = vmatprep.subr.bf16.mxu0 %v2442_v2  ;;  %1812 = vmatprep.subr.bf16.mxu1 %v2445_v3  ;;  %v2535_v2 = vld [vmem:[#allocation3 + $0x3ec] ss:$16 sps:$4 sm:$0xff]   ;;  %v2530_v3 = vld [vmem:[#allocation3 + $0x3e0] ss:$16 sps:$4 sm:$0xff]  }
  0x53   :  { %1640 = vmatmul.mubr.bf16.vlgmr.msra.gmra.mrb[0].mxu0 %v2047_v4  ;;  %1804 = vmatmul.mubr.bf16.vlgmr.msra.gmra.mrb[0].mxu1 %v2047_v4  ;;  %v2533_v4 = vld [vmem:[#allocation3 + $0x3e8] ss:$16 sps:$4 sm:$0xff]  }
  0x54   :  { %1649 = vmatpush1.bf16.msra.mxu0 %v2440_v5  ;;  %1813 = vmatpush1.bf16.msra.mxu1 %v2443_v6  ;;  %v2540_v5 = vld [vmem:[#allocation3 + $0x404] ss:$16 sps:$4 sm:$0xff]   ;;  %v2543_v6 = vld [vmem:[#allocation3 + $0x40c] ss:$16 sps:$4 sm:$0xff]  }
  0x55   :  { %1650 = vmatprep.subr.bf16.mxu0 %v2448_v7  ;;  %1814 = vmatprep.subr.bf16.mxu1 %v2451_v8  ;;  %v2049_v7 = vcombine.low %v2799_v29, %v2799_v29  ;;  %v2538_v8 = vld [vmem:[#allocation3 + $0x400] ss:$16 sps:$4 sm:$0xff]   ;;  %v2573_v29 = vld [vmem:[#allocation3 + $0x4ac] ss:$16 sps:$4 sm:$0xff]  }
  0x56   :  { %1680 = vmatprep.mubr.bf16.mxu0 %v2050_v30  ;;  %1844 = vmatprep.mubr.bf16.mxu1 %v2050_v30  ;;  %v2568_v30 = vld [vmem:[#allocation3 + $0x4a0] ss:$16 sps:$4 sm:$0xff]  }
  0x58   :  { %1651 = vmatpush1.bf16.msra.mxu0 %v2446_v9  ;;  %1815 = vmatpush1.bf16.msra.mxu1 %v2449_v10  ;;  %v2541_v9 = vld [vmem:[#allocation3 + $0x408] ss:$16 sps:$4 sm:$0xff]   ;;  %v2546_v10 = vld [vmem:[#allocation3 + $0x424] ss:$16 sps:$4 sm:$0xff]  }
  0x59   :  { %1652 = vmatprep.subr.bf16.mxu0 %v2454_v11  ;;  %1816 = vmatprep.subr.bf16.mxu1 %v2457_v12  ;;  %v2808_v11 = vld [vmem:[%s2849_s0 + $0x10] sm:$0xff]  ;;  %v2549_v12 = vld [vmem:[#allocation3 + $0x42c] ss:$16 sps:$4 sm:$0xff]  }
  0x5c   :  { %1653 = vmatpush1.bf16.msra.mxu0 %v2452_v13  ;;  %1817 = vmatpush1.bf16.msra.mxu1 %v2455_v14  ;;  %v2052_v13 = vcombine.high %v2808_v11, %v2808_v11  ;;  %v2544_v14 = vld [vmem:[#allocation3 + $0x420] ss:$16 sps:$4 sm:$0xff]  }
  0x5d   :  { %1654 = vmatprep.subr.bf16.mxu0 %v2460_v15  ;;  %1818 = vmatprep.subr.bf16.mxu1 %v2463_v16  ;;  %v2547_v15 = vld [vmem:[#allocation3 + $0x428] ss:$16 sps:$4 sm:$0xff]   ;;  %v2552_v16 = vld [vmem:[#allocation3 + $0x444] ss:$16 sps:$4 sm:$0xff]  }
  0x60   :  { %1655 = vmatpush1.bf16.msra.mxu0 %v2458_v17  ;;  %1819 = vmatpush1.bf16.msra.mxu1 %v2461_v18  ;;  %v2555_v17 = vld [vmem:[#allocation3 + $0x44c] ss:$16 sps:$4 sm:$0xff]   ;;  %v2550_v18 = vld [vmem:[#allocation3 + $0x440] ss:$16 sps:$4 sm:$0xff]  }
  0x61   :  { %1656 = vmatprep.subr.bf16.mxu0 %v2466_v19  ;;  %1820 = vmatprep.subr.bf16.mxu1 %v2469_v20  ;;  %v2553_v19 = vld [vmem:[#allocation3 + $0x448] ss:$16 sps:$4 sm:$0xff]   ;;  %v2558_v20 = vld [vmem:[#allocation3 + $0x464] ss:$16 sps:$4 sm:$0xff]  }
  0x64   :  { %1657 = vmatpush1.bf16.msra.mxu0 %v2464_v21  ;;  %1821 = vmatpush1.bf16.msra.mxu1 %v2467_v22  ;;  %v2561_v21 = vld [vmem:[#allocation3 + $0x46c] ss:$16 sps:$4 sm:$0xff]   ;;  %v2556_v22 = vld [vmem:[#allocation3 + $0x460] ss:$16 sps:$4 sm:$0xff]  }
  0x65   :  { %1658 = vmatprep.subr.bf16.mxu0 %v2472_v23  ;;  %1822 = vmatprep.subr.bf16.mxu1 %v2475_v24  ;;  %v2559_v23 = vld [vmem:[#allocation3 + $0x468] ss:$16 sps:$4 sm:$0xff]   ;;  %v2564_v24 = vld [vmem:[#allocation3 + $0x484] ss:$16 sps:$4 sm:$0xff]  }
  0x68   :  { %1659 = vmatpush1.bf16.msra.mxu0 %v2470_v25  ;;  %1823 = vmatpush1.bf16.msra.mxu1 %v2473_v26  ;;  %v2567_v25 = vld [vmem:[#allocation3 + $0x48c] ss:$16 sps:$4 sm:$0xff]   ;;  %v2562_v26 = vld [vmem:[#allocation3 + $0x480] ss:$16 sps:$4 sm:$0xff]  }
  0x69   :  { %1660 = vmatprep.subr.bf16.mxu0 %v2478_v27  ;;  %1824 = vmatprep.subr.bf16.mxu1 %v2481_v28  ;;  %v2565_v27 = vld [vmem:[#allocation3 + $0x488] ss:$16 sps:$4 sm:$0xff]   ;;  %v2570_v28 = vld [vmem:[#allocation3 + $0x4a4] ss:$16 sps:$4 sm:$0xff]  }
  0x6c   :  { %1661 = vmatpush1.bf16.msra.mxu0 %v2476_v31  ;;  %1825 = vmatpush1.bf16.msra.mxu1 %v2479_v32  ;;  %v2571_v31 = vld [vmem:[#allocation3 + $0x4a8] ss:$16 sps:$4 sm:$0xff]   ;;  %v2576_v32 = vld [vmem:[#allocation3 + $0x4c4] ss:$16 sps:$4 sm:$0xff]  }
  0x6d   :  { %1662 = vmatprep.subr.bf16.mxu0 %v2484_v33  ;;  %1826 = vmatprep.subr.bf16.mxu1 %v2487_v34  ;;  %v2579_v33 = vld [vmem:[#allocation3 + $0x4cc] ss:$16 sps:$4 sm:$0xff]   ;;  %v2574_v34 = vld [vmem:[#allocation3 + $0x4c0] ss:$16 sps:$4 sm:$0xff]  }
  0x70   :  { %1663 = vmatpush1.bf16.msra.mxu0 %v2482_v35  ;;  %1827 = vmatpush1.bf16.msra.mxu1 %v2485_v36  ;;  %v2577_v35 = vld [vmem:[#allocation3 + $0x4c8] ss:$16 sps:$4 sm:$0xff]   ;;  %v2582_v36 = vld [vmem:[#allocation3 + $0x4e4] ss:$16 sps:$4 sm:$0xff]  }
  0x71   :  { %1664 = vmatprep.subr.bf16.mxu0 %v2490_v37  ;;  %1828 = vmatprep.subr.bf16.mxu1 %v2493_v38  ;;  %v2585_v37 = vld [vmem:[#allocation3 + $0x4ec] ss:$16 sps:$4 sm:$0xff]   ;;  %v2580_v38 = vld [vmem:[#allocation3 + $0x4e0] ss:$16 sps:$4 sm:$0xff]  }
  0x74   :  { %1665 = vmatpush1.bf16.msra.mxu0 %v2488_v39  ;;  %1829 = vmatpush1.bf16.msra.mxu1 %v2491_v40  ;;  %v2583_v39 = vld [vmem:[#allocation3 + $0x4e8] ss:$16 sps:$4 sm:$0xff]   ;;  %v2588_v40 = vld [vmem:[#allocation3 + $0x504] ss:$16 sps:$4 sm:$0xff]  }
  0x75   :  { %1666 = vmatprep.subr.bf16.mxu0 %v2496_v41  ;;  %1830 = vmatprep.subr.bf16.mxu1 %v2499_v42  ;;  %v2591_v41 = vld [vmem:[#allocation3 + $0x50c] ss:$16 sps:$4 sm:$0xff]   ;;  %v2586_v42 = vld [vmem:[#allocation3 + $0x500] ss:$16 sps:$4 sm:$0xff]  }
  0x78   :  { %1667 = vmatpush1.bf16.msra.mxu0 %v2494_v43  ;;  %1831 = vmatpush1.bf16.msra.mxu1 %v2497_v44  ;;  %v2589_v43 = vld [vmem:[#allocation3 + $0x508] ss:$16 sps:$4 sm:$0xff]   ;;  %v2594_v44 = vld [vmem:[#allocation3 + $0x524] ss:$16 sps:$4 sm:$0xff]  }
  0x79   :  { %1668 = vmatprep.subr.bf16.mxu0 %v2502_v45  ;;  %1832 = vmatprep.subr.bf16.mxu1 %v2505_v46  ;;  %v2597_v45 = vld [vmem:[#allocation3 + $0x52c] ss:$16 sps:$4 sm:$0xff]   ;;  %v2592_v46 = vld [vmem:[#allocation3 + $0x520] ss:$16 sps:$4 sm:$0xff]  }
  0x7c   :  { %1669 = vmatpush1.bf16.msra.mxu0 %v2500_v47  ;;  %1833 = vmatpush1.bf16.msra.mxu1 %v2503_v48  ;;  %v2595_v47 = vld [vmem:[#allocation3 + $0x528] ss:$16 sps:$4 sm:$0xff]   ;;  %v2600_v48 = vld [vmem:[#allocation3 + $0x544] ss:$16 sps:$4 sm:$0xff]  }
  0x7d   :  { %1670 = vmatprep.subr.bf16.mxu0 %v2508_v49  ;;  %1834 = vmatprep.subr.bf16.mxu1 %v2511_v50  ;;  %v2603_v49 = vld [vmem:[#allocation3 + $0x54c] ss:$16 sps:$4 sm:$0xff]   ;;  %v2598_v50 = vld [vmem:[#allocation3 + $0x540] ss:$16 sps:$4 sm:$0xff]  }
  0x80   :  { %1671 = vmatpush1.bf16.msra.mxu0 %v2506_v51  ;;  %1835 = vmatpush1.bf16.msra.mxu1 %v2509_v52  ;;  %v2601_v51 = vld [vmem:[#allocation3 + $0x548] ss:$16 sps:$4 sm:$0xff]   ;;  %v2606_v52 = vld [vmem:[#allocation3 + $0x564] ss:$16 sps:$4 sm:$0xff]  }
  0x81   :  { %1672 = vmatprep.subr.bf16.mxu0 %v2514_v53  ;;  %1836 = vmatprep.subr.bf16.mxu1 %v2517_v54  ;;  %v2609_v53 = vld [vmem:[#allocation3 + $0x56c] ss:$16 sps:$4 sm:$0xff]   ;;  %v2604_v54 = vld [vmem:[#allocation3 + $0x560] ss:$16 sps:$4 sm:$0xff]  }
  0x84   :  { %1673 = vmatpush1.bf16.msra.mxu0 %v2512_v55  ;;  %1837 = vmatpush1.bf16.msra.mxu1 %v2515_v56  ;;  %v2607_v55 = vld [vmem:[#allocation3 + $0x568] ss:$16 sps:$4 sm:$0xff]   ;;  %v2612_v56 = vld [vmem:[#allocation3 + $0x584] ss:$16 sps:$4 sm:$0xff]  }
  0x85   :  { %1674 = vmatprep.subr.bf16.mxu0 %v2520_v57  ;;  %1838 = vmatprep.subr.bf16.mxu1 %v2523_v58  ;;  %v2615_v57 = vld [vmem:[#allocation3 + $0x58c] ss:$16 sps:$4 sm:$0xff]   ;;  %v2610_v58 = vld [vmem:[#allocation3 + $0x580] ss:$16 sps:$4 sm:$0xff]  }
  0x88   :  { %1675 = vmatpush1.bf16.msra.mxu0 %v2518_v59  ;;  %1839 = vmatpush1.bf16.msra.mxu1 %v2521_v60  ;;  %v2613_v59 = vld [vmem:[#allocation3 + $0x588] ss:$16 sps:$4 sm:$0xff]   ;;  %v2618_v60 = vld [vmem:[#allocation3 + $0x5a4] ss:$16 sps:$4 sm:$0xff]  }
  0x89   :  { %1676 = vmatprep.subr.bf16.mxu0 %v2526_v61  ;;  %1840 = vmatprep.subr.bf16.mxu1 %v2529_v62  ;;  %v2621_v61 = vld [vmem:[#allocation3 + $0x5ac] ss:$16 sps:$4 sm:$0xff]   ;;  %v2616_v62 = vld [vmem:[#allocation3 + $0x5a0] ss:$16 sps:$4 sm:$0xff]  }
  0x8c   :  { %1677 = vmatpush1.bf16.msra.mxu0 %v2524_v63  ;;  %1841 = vmatpush1.bf16.msra.mxu1 %v2527_v0  ;;  %v2619_v63 = vld [vmem:[#allocation3 + $0x5a8] ss:$16 sps:$4 sm:$0xff]   ;;  %v2624_v0 = vld [vmem:[#allocation3 + $0x5c4] ss:$16 sps:$4 sm:$0xff]  }
  0x8d   :  { %1678 = vmatprep.subr.bf16.mxu0 %v2532_v1  ;;  %1842 = vmatprep.subr.bf16.mxu1 %v2535_v2  ;;  %v2627_v1 = vld [vmem:[#allocation3 + $0x5cc] ss:$16 sps:$4 sm:$0xff]   ;;  %v2622_v2 = vld [vmem:[#allocation3 + $0x5c0] ss:$16 sps:$4 sm:$0xff]  }
  0x90   :  { %1679 = vmatpush1.bf16.msra.mxu0 %v2530_v3  ;;  %1843 = vmatpush1.bf16.msra.mxu1 %v2533_v4  ;;  %v2625_v3 = vld [vmem:[#allocation3 + $0x5c8] ss:$16 sps:$4 sm:$0xff]   ;;  %v2630_v4 = vld [vmem:[#allocation3 + $0x5e4] ss:$16 sps:$4 sm:$0xff]  }
  0x91   :  { %1689 = vmatprep.subr.bf16.mxu0 %v2540_v5  ;;  %1853 = vmatprep.subr.bf16.mxu1 %v2543_v6  ;;  %v2633_v5 = vld [vmem:[#allocation3 + $0x5ec] ss:$16 sps:$4 sm:$0xff]   ;;  %v2628_v6 = vld [vmem:[#allocation3 + $0x5e0] ss:$16 sps:$4 sm:$0xff]  }
  0x93   :  { %1681 = vmatmul.mubr.bf16.vlgmr.msra.gmra.mrb[0].mxu0 %v2049_v7  ;;  %1845 = vmatmul.mubr.bf16.vlgmr.msra.gmra.mrb[0].mxu1 %v2049_v7  ;;  %v2631_v7 = vld [vmem:[#allocation3 + $0x5e8] ss:$16 sps:$4 sm:$0xff]  }
  0x94   :  { %1690 = vmatpush1.bf16.msra.mxu0 %v2538_v8  ;;  %1854 = vmatpush1.bf16.msra.mxu1 %v2541_v9  ;;  %v2638_v8 = vld [vmem:[#allocation3 + $0x604] ss:$16 sps:$4 sm:$0xff]   ;;  %v2641_v9 = vld [vmem:[#allocation3 + $0x60c] ss:$16 sps:$4 sm:$0xff]  }
  0x95   :  { %1691 = vmatprep.subr.bf16.mxu0 %v2546_v10  ;;  %1855 = vmatprep.subr.bf16.mxu1 %v2549_v12  ;;  %v2051_v10 = vcombine.low %v2808_v11, %v2808_v11  ;;  %v2817_v12 = vld [vmem:[%s2849_s0 + $0x18] sm:$0xff]  ;;  %v2642_v11 = vld [vmem:[#allocation3 + $0x620] ss:$16 sps:$4 sm:$0xff]  }
  0x96   :  { %1721 = vmatprep.mubr.bf16.mxu0 %v2052_v13  ;;  %1885 = vmatprep.mubr.bf16.mxu1 %v2052_v13  ;;  %v2636_v13 = vld [vmem:[#allocation3 + $0x600] ss:$16 sps:$4 sm:$0xff]  }
  0x98   :  { %1692 = vmatpush1.bf16.msra.mxu0 %v2544_v14  ;;  %1856 = vmatpush1.bf16.msra.mxu1 %v2547_v15  ;;  %v2639_v14 = vld [vmem:[#allocation3 + $0x608] ss:$16 sps:$4 sm:$0xff]   ;;  %v2644_v15 = vld [vmem:[#allocation3 + $0x624] ss:$16 sps:$4 sm:$0xff]  }
  0x99   :  { %1693 = vmatprep.subr.bf16.mxu0 %v2552_v16  ;;  %1857 = vmatprep.subr.bf16.mxu1 %v2555_v17  ;;  %v2647_v16 = vld [vmem:[#allocation3 + $0x62c] ss:$16 sps:$4 sm:$0xff]   ;;  %v2054_v17 = vcombine.high %v2817_v12, %v2817_v12 }
  0x9c   :  { %1694 = vmatpush1.bf16.msra.mxu0 %v2550_v18  ;;  %1858 = vmatpush1.bf16.msra.mxu1 %v2553_v19  ;;  %v2645_v18 = vld [vmem:[#allocation3 + $0x628] ss:$16 sps:$4 sm:$0xff]   ;;  %v2650_v19 = vld [vmem:[#allocation3 + $0x644] ss:$16 sps:$4 sm:$0xff]  }
  0x9d   :  { %1695 = vmatprep.subr.bf16.mxu0 %v2558_v20  ;;  %1859 = vmatprep.subr.bf16.mxu1 %v2561_v21  ;;  %v2653_v20 = vld [vmem:[#allocation3 + $0x64c] ss:$16 sps:$4 sm:$0xff]   ;;  %v2648_v21 = vld [vmem:[#allocation3 + $0x640] ss:$16 sps:$4 sm:$0xff]  }
  0xa0   :  { %1696 = vmatpush1.bf16.msra.mxu0 %v2556_v22  ;;  %1860 = vmatpush1.bf16.msra.mxu1 %v2559_v23  ;;  %v2651_v22 = vld [vmem:[#allocation3 + $0x648] ss:$16 sps:$4 sm:$0xff]   ;;  %v2656_v23 = vld [vmem:[#allocation3 + $0x664] ss:$16 sps:$4 sm:$0xff]  }
  0xa1   :  { %1697 = vmatprep.subr.bf16.mxu0 %v2564_v24  ;;  %1861 = vmatprep.subr.bf16.mxu1 %v2567_v25  ;;  %v2659_v24 = vld [vmem:[#allocation3 + $0x66c] ss:$16 sps:$4 sm:$0xff]   ;;  %v2654_v25 = vld [vmem:[#allocation3 + $0x660] ss:$16 sps:$4 sm:$0xff]  }
  0xa4   :  { %1698 = vmatpush1.bf16.msra.mxu0 %v2562_v26  ;;  %1862 = vmatpush1.bf16.msra.mxu1 %v2565_v27  ;;  %v2657_v26 = vld [vmem:[#allocation3 + $0x668] ss:$16 sps:$4 sm:$0xff]   ;;  %v2662_v27 = vld [vmem:[#allocation3 + $0x684] ss:$16 sps:$4 sm:$0xff]  }
  0xa5   :  { %1699 = vmatprep.subr.bf16.mxu0 %v2570_v28  ;;  %1863 = vmatprep.subr.bf16.mxu1 %v2573_v29  ;;  %v2665_v28 = vld [vmem:[#allocation3 + $0x68c] ss:$16 sps:$4 sm:$0xff]   ;;  %v2660_v29 = vld [vmem:[#allocation3 + $0x680] ss:$16 sps:$4 sm:$0xff]  }
  0xa8   :  { %1700 = vmatpush1.bf16.msra.mxu0 %v2568_v30  ;;  %1864 = vmatpush1.bf16.msra.mxu1 %v2571_v31  ;;  %v2663_v30 = vld [vmem:[#allocation3 + $0x688] ss:$16 sps:$4 sm:$0xff]   ;;  %v2668_v31 = vld [vmem:[#allocation3 + $0x6a4] ss:$16 sps:$4 sm:$0xff]  }
  0xa9   :  { %1701 = vmatprep.subr.bf16.mxu0 %v2576_v32  ;;  %1865 = vmatprep.subr.bf16.mxu1 %v2579_v33  ;;  %v2671_v32 = vld [vmem:[#allocation3 + $0x6ac] ss:$16 sps:$4 sm:$0xff]   ;;  %v2666_v33 = vld [vmem:[#allocation3 + $0x6a0] ss:$16 sps:$4 sm:$0xff]  }
  0xac   :  { %1702 = vmatpush1.bf16.msra.mxu0 %v2574_v34  ;;  %1866 = vmatpush1.bf16.msra.mxu1 %v2577_v35  ;;  %v2669_v34 = vld [vmem:[#allocation3 + $0x6a8] ss:$16 sps:$4 sm:$0xff]   ;;  %v2674_v35 = vld [vmem:[#allocation3 + $0x6c4] ss:$16 sps:$4 sm:$0xff]  }
  0xad   :  { %1703 = vmatprep.subr.bf16.mxu0 %v2582_v36  ;;  %1867 = vmatprep.subr.bf16.mxu1 %v2585_v37  ;;  %v2677_v36 = vld [vmem:[#allocation3 + $0x6cc] ss:$16 sps:$4 sm:$0xff]   ;;  %v2672_v37 = vld [vmem:[#allocation3 + $0x6c0] ss:$16 sps:$4 sm:$0xff]  }
  0xb0   :  { %1704 = vmatpush1.bf16.msra.mxu0 %v2580_v38  ;;  %1868 = vmatpush1.bf16.msra.mxu1 %v2583_v39  ;;  %v2675_v38 = vld [vmem:[#allocation3 + $0x6c8] ss:$16 sps:$4 sm:$0xff]   ;;  %v2680_v39 = vld [vmem:[#allocation3 + $0x6e4] ss:$16 sps:$4 sm:$0xff]  }
  0xb1   :  { %1705 = vmatprep.subr.bf16.mxu0 %v2588_v40  ;;  %1869 = vmatprep.subr.bf16.mxu1 %v2591_v41  ;;  %v2683_v40 = vld [vmem:[#allocation3 + $0x6ec] ss:$16 sps:$4 sm:$0xff]   ;;  %v2678_v41 = vld [vmem:[#allocation3 + $0x6e0] ss:$16 sps:$4 sm:$0xff]  }
  0xb4   :  { %1706 = vmatpush1.bf16.msra.mxu0 %v2586_v42  ;;  %1870 = vmatpush1.bf16.msra.mxu1 %v2589_v43  ;;  %v2681_v42 = vld [vmem:[#allocation3 + $0x6e8] ss:$16 sps:$4 sm:$0xff]   ;;  %v2686_v43 = vld [vmem:[#allocation3 + $0x704] ss:$16 sps:$4 sm:$0xff]  }
  0xb5   :  { %1707 = vmatprep.subr.bf16.mxu0 %v2594_v44  ;;  %1871 = vmatprep.subr.bf16.mxu1 %v2597_v45  ;;  %v2689_v44 = vld [vmem:[#allocation3 + $0x70c] ss:$16 sps:$4 sm:$0xff]   ;;  %v2684_v45 = vld [vmem:[#allocation3 + $0x700] ss:$16 sps:$4 sm:$0xff]  }
  0xb8   :  { %1708 = vmatpush1.bf16.msra.mxu0 %v2592_v46  ;;  %1872 = vmatpush1.bf16.msra.mxu1 %v2595_v47  ;;  %v2687_v46 = vld [vmem:[#allocation3 + $0x708] ss:$16 sps:$4 sm:$0xff]   ;;  %v2692_v47 = vld [vmem:[#allocation3 + $0x724] ss:$16 sps:$4 sm:$0xff]  }
  0xb9   :  { %1709 = vmatprep.subr.bf16.mxu0 %v2600_v48  ;;  %1873 = vmatprep.subr.bf16.mxu1 %v2603_v49  ;;  %v2695_v48 = vld [vmem:[#allocation3 + $0x72c] ss:$16 sps:$4 sm:$0xff]   ;;  %v2690_v49 = vld [vmem:[#allocation3 + $0x720] ss:$16 sps:$4 sm:$0xff]  }
  0xbc   :  { %1710 = vmatpush1.bf16.msra.mxu0 %v2598_v50  ;;  %1874 = vmatpush1.bf16.msra.mxu1 %v2601_v51  ;;  %v2693_v50 = vld [vmem:[#allocation3 + $0x728] ss:$16 sps:$4 sm:$0xff]   ;;  %v2698_v51 = vld [vmem:[#allocation3 + $0x744] ss:$16 sps:$4 sm:$0xff]  }
  0xbd   :  { %1711 = vmatprep.subr.bf16.mxu0 %v2606_v52  ;;  %1875 = vmatprep.subr.bf16.mxu1 %v2609_v53  ;;  %v2701_v52 = vld [vmem:[#allocation3 + $0x74c] ss:$16 sps:$4 sm:$0xff]   ;;  %v2696_v53 = vld [vmem:[#allocation3 + $0x740] ss:$16 sps:$4 sm:$0xff]  }
  0xc0   :  { %1712 = vmatpush1.bf16.msra.mxu0 %v2604_v54  ;;  %1876 = vmatpush1.bf16.msra.mxu1 %v2607_v55  ;;  %v2699_v54 = vld [vmem:[#allocation3 + $0x748] ss:$16 sps:$4 sm:$0xff]   ;;  %v2704_v55 = vld [vmem:[#allocation3 + $0x764] ss:$16 sps:$4 sm:$0xff]  }
  0xc1   :  { %1713 = vmatprep.subr.bf16.mxu0 %v2612_v56  ;;  %1877 = vmatprep.subr.bf16.mxu1 %v2615_v57  ;;  %v2707_v56 = vld [vmem:[#allocation3 + $0x76c] ss:$16 sps:$4 sm:$0xff]   ;;  %v2702_v57 = vld [vmem:[#allocation3 + $0x760] ss:$16 sps:$4 sm:$0xff]  }
  0xc4   :  { %1714 = vmatpush1.bf16.msra.mxu0 %v2610_v58  ;;  %1878 = vmatpush1.bf16.msra.mxu1 %v2613_v59  ;;  %v2705_v58 = vld [vmem:[#allocation3 + $0x768] ss:$16 sps:$4 sm:$0xff]   ;;  %v2710_v59 = vld [vmem:[#allocation3 + $0x784] ss:$16 sps:$4 sm:$0xff]  }
  0xc5   :  { %1715 = vmatprep.subr.bf16.mxu0 %v2618_v60  ;;  %1879 = vmatprep.subr.bf16.mxu1 %v2621_v61  ;;  %v2713_v60 = vld [vmem:[#allocation3 + $0x78c] ss:$16 sps:$4 sm:$0xff]   ;;  %v2708_v61 = vld [vmem:[#allocation3 + $0x780] ss:$16 sps:$4 sm:$0xff]  }
  0xc8   :  { %1716 = vmatpush1.bf16.msra.mxu0 %v2616_v62  ;;  %1880 = vmatpush1.bf16.msra.mxu1 %v2619_v63  ;;  %v2711_v62 = vld [vmem:[#allocation3 + $0x788] ss:$16 sps:$4 sm:$0xff]   ;;  %v2716_v63 = vld [vmem:[#allocation3 + $0x7a4] ss:$16 sps:$4 sm:$0xff]  }
  0xc9   :  { %1717 = vmatprep.subr.bf16.mxu0 %v2624_v0  ;;  %1881 = vmatprep.subr.bf16.mxu1 %v2627_v1  ;;  %v2719_v0 = vld [vmem:[#allocation3 + $0x7ac] ss:$16 sps:$4 sm:$0xff]   ;;  %v2714_v1 = vld [vmem:[#allocation3 + $0x7a0] ss:$16 sps:$4 sm:$0xff]  }
  0xcc   :  { %1718 = vmatpush1.bf16.msra.mxu0 %v2622_v2  ;;  %1882 = vmatpush1.bf16.msra.mxu1 %v2625_v3  ;;  %v2717_v2 = vld [vmem:[#allocation3 + $0x7a8] ss:$16 sps:$4 sm:$0xff]   ;;  %v2722_v3 = vld [vmem:[#allocation3 + $0x7c4] ss:$16 sps:$4 sm:$0xff]  }
  0xcd   :  { %1719 = vmatprep.subr.bf16.mxu0 %v2630_v4  ;;  %1883 = vmatprep.subr.bf16.mxu1 %v2633_v5  ;;  %v2725_v4 = vld [vmem:[#allocation3 + $0x7cc] ss:$16 sps:$4 sm:$0xff]   ;;  %v2720_v5 = vld [vmem:[#allocation3 + $0x7c0] ss:$16 sps:$4 sm:$0xff]  }
  0xd0   :  { %1720 = vmatpush1.bf16.msra.mxu0 %v2628_v6  ;;  %1884 = vmatpush1.bf16.msra.mxu1 %v2631_v7  ;;  %v2723_v6 = vld [vmem:[#allocation3 + $0x7c8] ss:$16 sps:$4 sm:$0xff]   ;;  %v2728_v7 = vld [vmem:[#allocation3 + $0x7e4] ss:$16 sps:$4 sm:$0xff]  }
  0xd1   :  { %1730 = vmatprep.subr.bf16.mxu0 %v2638_v8  ;;  %1894 = vmatprep.subr.bf16.mxu1 %v2641_v9  ;;  %v2731_v8 = vld [vmem:[#allocation3 + $0x7ec] ss:$16 sps:$4 sm:$0xff]   ;;  %v2726_v9 = vld [vmem:[#allocation3 + $0x7e0] ss:$16 sps:$4 sm:$0xff]  }
  0xd3   :  { %1722 = vmatmul.mubr.bf16.vlgmr.msra.gmra.mrb[0].mxu0 %v2051_v10  ;;  %1886 = vmatmul.mubr.bf16.vlgmr.msra.gmra.mrb[0].mxu1 %v2051_v10  ;;  %v2729_v10 = vld [vmem:[#allocation3 + $0x7e8] ss:$16 sps:$4 sm:$0xff]  }
  0xd4   :  { %1731 = vmatpush1.bf16.msra.mxu0 %v2636_v13  ;;  %1895 = vmatpush1.bf16.msra.mxu1 %v2639_v14  ;;  %v2053_v13 = vcombine.low %v2817_v12, %v2817_v12 }
  0xd5   :  { %1732 = vmatprep.subr.bf16.mxu0 %v2644_v15  ;;  %1896 = vmatprep.subr.bf16.mxu1 %v2647_v16 }
  0xd6   :  { %1762 = vmatprep.mubr.bf16.mxu0 %v2054_v17  ;;  %1926 = vmatprep.mubr.bf16.mxu1 %v2054_v17 }
  0xd8   :  { %1733 = vmatpush1.bf16.msra.mxu0 %v2642_v11  ;;  %1897 = vmatpush1.bf16.msra.mxu1 %v2645_v18 }
  0xd9   :  { %1734 = vmatprep.subr.bf16.mxu0 %v2650_v19  ;;  %1898 = vmatprep.subr.bf16.mxu1 %v2653_v20 }
  0xdc   :  { %1735 = vmatpush1.bf16.msra.mxu0 %v2648_v21  ;;  %1899 = vmatpush1.bf16.msra.mxu1 %v2651_v22 }
  0xdd   :  { %1736 = vmatprep.subr.bf16.mxu0 %v2656_v23  ;;  %1900 = vmatprep.subr.bf16.mxu1 %v2659_v24 }
  0xe0   :  { %1737 = vmatpush1.bf16.msra.mxu0 %v2654_v25  ;;  %1901 = vmatpush1.bf16.msra.mxu1 %v2657_v26 }
  0xe1   :  { %1738 = vmatprep.subr.bf16.mxu0 %v2662_v27  ;;  %1902 = vmatprep.subr.bf16.mxu1 %v2665_v28 }
  0xe4   :  { %1739 = vmatpush1.bf16.msra.mxu0 %v2660_v29  ;;  %1903 = vmatpush1.bf16.msra.mxu1 %v2663_v30 }
  0xe5   :  { %1740 = vmatprep.subr.bf16.mxu0 %v2668_v31  ;;  %1904 = vmatprep.subr.bf16.mxu1 %v2671_v32 }
  0xe8   :  { %1741 = vmatpush1.bf16.msra.mxu0 %v2666_v33  ;;  %1905 = vmatpush1.bf16.msra.mxu1 %v2669_v34 }
  0xe9   :  { %1742 = vmatprep.subr.bf16.mxu0 %v2674_v35  ;;  %1906 = vmatprep.subr.bf16.mxu1 %v2677_v36 }
  0xec   :  { %1743 = vmatpush1.bf16.msra.mxu0 %v2672_v37  ;;  %1907 = vmatpush1.bf16.msra.mxu1 %v2675_v38 }
  0xed   :  { %1744 = vmatprep.subr.bf16.mxu0 %v2680_v39  ;;  %1908 = vmatprep.subr.bf16.mxu1 %v2683_v40 }
  0xf0   :  { %1745 = vmatpush1.bf16.msra.mxu0 %v2678_v41  ;;  %1909 = vmatpush1.bf16.msra.mxu1 %v2681_v42 }
  0xf1   :  { %1746 = vmatprep.subr.bf16.mxu0 %v2686_v43  ;;  %1910 = vmatprep.subr.bf16.mxu1 %v2689_v44 }
  0xf4   :  { %1747 = vmatpush1.bf16.msra.mxu0 %v2684_v45  ;;  %1911 = vmatpush1.bf16.msra.mxu1 %v2687_v46 }
  0xf5   :  { %1748 = vmatprep.subr.bf16.mxu0 %v2692_v47  ;;  %1912 = vmatprep.subr.bf16.mxu1 %v2695_v48 }
  0xf8   :  { %1749 = vmatpush1.bf16.msra.mxu0 %v2690_v49  ;;  %1913 = vmatpush1.bf16.msra.mxu1 %v2693_v50 }
  0xf9   :  { %1750 = vmatprep.subr.bf16.mxu0 %v2698_v51  ;;  %1914 = vmatprep.subr.bf16.mxu1 %v2701_v52 }
  0xfc   :  { %1751 = vmatpush1.bf16.msra.mxu0 %v2696_v53  ;;  %1915 = vmatpush1.bf16.msra.mxu1 %v2699_v54 }
  0xfd   :  { %1752 = vmatprep.subr.bf16.mxu0 %v2704_v55  ;;  %1916 = vmatprep.subr.bf16.mxu1 %v2707_v56 }
 0x100   :  { %1753 = vmatpush1.bf16.msra.mxu0 %v2702_v57  ;;  %1917 = vmatpush1.bf16.msra.mxu1 %v2705_v58 }
 0x101   :  { %1754 = vmatprep.subr.bf16.mxu0 %v2710_v59  ;;  %1918 = vmatprep.subr.bf16.mxu1 %v2713_v60 }
 0x104   :  { %1755 = vmatpush1.bf16.msra.mxu0 %v2708_v61  ;;  %1919 = vmatpush1.bf16.msra.mxu1 %v2711_v62 }
 0x105   :  { %1756 = vmatprep.subr.bf16.mxu0 %v2716_v63  ;;  %1920 = vmatprep.subr.bf16.mxu1 %v2719_v0 }
 0x108   :  { %1757 = vmatpush1.bf16.msra.mxu0 %v2714_v1  ;;  %1921 = vmatpush1.bf16.msra.mxu1 %v2717_v2 }
 0x109   :  { %1758 = vmatprep.subr.bf16.mxu0 %v2722_v3  ;;  %1922 = vmatprep.subr.bf16.mxu1 %v2725_v4 }
 0x10c   :  { %1759 = vmatpush1.bf16.msra.mxu0 %v2720_v5  ;;  %1923 = vmatpush1.bf16.msra.mxu1 %v2723_v6 }
 0x10d   :  { %1760 = vmatprep.subr.bf16.mxu0 %v2728_v7  ;;  %1924 = vmatprep.subr.bf16.mxu1 %v2731_v8 }
 0x110   :  { %1761 = vmatpush1.bf16.msra.mxu0 %v2726_v9  ;;  %1925 = vmatpush1.bf16.msra.mxu1 %v2729_v10 }
 0x113   :  { %1763 = vmatmul.mubr.bf16.vlgmr.msra.gmra.mrb[0].mxu0 %v2053_v13  ;;  %1927 = vmatmul.mubr.bf16.vlgmr.msra.gmra.mrb[0].mxu1 %v2053_v13 }
 0x1e6   :  { %v1764_v14 = vpop.f32.mrb[0].mxu0  ;;  %v1928_v15 = vpop.f32.mrb[0].mxu1 }
 0x1e7   :  { %v1950_v16 = vmul.f32 1.4285715, %v1764_v14  ;;  %v1952_v17 = vmul.f32 1.4285715, %v1928_v15  ;;  %v1766_v11 = vpop.f32.mrb[1].mxu0  ;;  %v1930_v18 = vpop.f32.mrb[1].mxu1 }
 0x1e8   :  { %v1951_v19 = vmul.f32 1.4285715, %v1766_v11  ;;  %v1953_v20 = vmul.f32 1.4285715, %v1930_v18  ;;  %v1768_v21 = vpop.f32.mrb[2].mxu0  ;;  %v1932_v22 = vpop.f32.mrb[2].mxu1 }
 0x1e9   :  { %v1972_v23 = vrot.slane %v1950_v16, 4  ;;  %v1996_v24 = vmul.f32 %v1950_v16, %v1950_v16  ;;  %v1984_v25 = vrot.slane %v1952_v17, 4  ;;  %v1998_v26 = vmul.f32 %v1952_v17, %v1952_v17  ;;  %v1769_v27 = vpop.f32.mrb[3].mxu0  ;;  %v1933_v12 = vpop.f32.mrb[3].mxu1 }
 0x1ea   :  { %v2313_v28 = vpack.c.bf16 %v1951_v19, %v1950_v16  ;;  %v1978_v29 = vrot.slane %v1951_v19, 4  ;;  %v1997_v30 = vmul.f32 %v1951_v19, %v1951_v19  ;;  %v2314_v31 = vpack.c.bf16 %v1953_v20, %v1952_v17 }
 0x1eb   :  { %v1973_v32 = vadd.f32 %v1972_v23, %v1950_v16  ;;  %v2000_v33 = vrot.slane %v1996_v24, 4  ;;  %v1985_v34 = vadd.f32 %v1984_v25, %v1952_v17  ;;  %v2012_v35 = vrot.slane %v1998_v26, 4 }
 0x1ec   :  { %1970 = vst [vmem:[%s2851_s2] sm:$0xff] %v2313_v28  ;;  %v1979_v36 = vadd.f32 %v1978_v29, %v1951_v19  ;;  %v2006_v37 = vrot.slane %v1997_v30, 4  ;;  %1971 = vst [vmem:[%s2851_s2 + $0x8] sm:$0xff] %v2314_v31  ;;  %v1990_v38 = vrot.slane %v1953_v20, 4  ;;  %v1999_v39 = vmul.f32 %v1953_v20, %v1953_v20 }
 0x1ed   :  { %v1974_v40 = vrot.slane %v1973_v32, 2  ;;  %v2001_v41 = vadd.f32 %v2000_v33, %v1996_v24  ;;  %v1986_v42 = vrot.slane %v1985_v34, 2  ;;  %v2013_v43 = vadd.f32 %v2012_v35, %v1998_v26 }
 0x1ee   :  { %v1980_v44 = vrot.slane %v1979_v36, 2  ;;  %v2007_v45 = vadd.f32 %v2006_v37, %v1997_v30  ;;  %v1991_v46 = vadd.f32 %v1990_v38, %v1953_v20  ;;  %v2018_v47 = vrot.slane %v1999_v39, 4 }
 0x1ef   :  { %v1975_v48 = vadd.f32 %v1974_v40, %v1973_v32  ;;  %v2002_v49 = vrot.slane %v2001_v41, 2  ;;  %v1987_v50 = vadd.f32 %v1986_v42, %v1985_v34  ;;  %v2014_v51 = vrot.slane %v2013_v43, 2 }
 0x1f0   :  { %v1981_v52 = vadd.f32 %v1980_v44, %v1979_v36  ;;  %v2008_v53 = vrot.slane %v2007_v45, 2  ;;  %v1992_v54 = vrot.slane %v1991_v46, 2  ;;  %v2019_v55 = vadd.f32 %v2018_v47, %v1999_v39 }
 0x1f1   :  { %v1976_v56 = vrot.slane %v1975_v48, 1  ;;  %v2003_v57 = vadd.f32 %v2002_v49, %v2001_v41  ;;  %v1988_v58 = vrot.slane %v1987_v50, 1  ;;  %v2015_v59 = vadd.f32 %v2014_v51, %v2013_v43 }
 0x1f2   :  { %v1982_v60 = vrot.slane %v1981_v52, 1  ;;  %v2009_v61 = vadd.f32 %v2008_v53, %v2007_v45  ;;  %v1993_v62 = vadd.f32 %v1992_v54, %v1991_v46  ;;  %v2020_v63 = vrot.slane %v2019_v55, 2 }
 0x1f3   :  { %v2004_v0 = vrot.slane %v2003_v57, 1  ;;  %v2016_v1 = vrot.slane %v2015_v59, 1  ;;  %v1977_v5 = vadd.f32 %v1976_v56, %v1975_v48  ;;  %v1989_v7 = vadd.f32 %v1988_v58, %v1987_v50 }
 0x1f4   :  { %v2010_v2 = vrot.slane %v2009_v61, 1  ;;  %v1994_v3 = vrot.slane %v1993_v62, 1  ;;  %v2021_v4 = vadd.f32 %v2020_v63, %v2019_v55  ;;  %v1983_v9 = vadd.f32 %v1982_v60, %v1981_v52 }
 0x1f5   :  { %v2005_v6 = vadd.f32 %v2004_v0, %v2003_v57  ;;  %v2017_v8 = vadd.f32 %v2016_v1, %v2015_v59 }
 0x1f6   :  { %v2011_v10 = vadd.f32 %v2010_v2, %v2009_v61  ;;  %v2022_v13 = vrot.slane %v2021_v4, 1  ;;  %v1995_v16 = vadd.f32 %v1994_v3, %v1993_v62 }
 0x1f7   :  { %v2025_v14 = vsel %vm2024_vm0, %v1977_v5, %v2005_v6  ;;  %v2027_v15 = vsel %vm2024_vm0, %v1989_v7, %v2017_v8 }
 0x1f8   :  { %v2030_v17 = vsel %vm2029_vm1, %v2025_v14, 0.0  ;;  %v2032_v11 = vsel %vm2029_vm1, %v2027_v15, 0.0  ;;  %v2026_v18 = vsel %vm2024_vm0, %v1983_v9, %v2011_v10  ;;  %v2023_v19 = vadd.f32 %v2022_v13, %v2021_v4 }
 0x1f9   :  { %2034 = vst [vmem:[%s2852_s3] sm:$0xff] %v2030_v17  ;;  %2036 = vst [vmem:[%s2852_s3 + $0x10] sm:$0xff] %v2032_v11  ;;  %v2031_v20 = vsel %vm2029_vm1, %v2026_v18, 0.0 }
 0x1fa   :  { %2035 = vst [vmem:[%s2852_s3 + $0x8] sm:$0xff] %v2031_v20  ;;  %v2028_v21 = vsel %vm2024_vm0, %v1995_v16, %v2023_v19 }
 0x1fb   :  { %v2033_v22 = vsel %vm2029_vm1, %v2028_v21, 0.0 }
 0x1fc   :  { %2037 = vst [vmem:[%s2852_s3 + $0x18] sm:$0xff] %v2033_v22 }
 0x1fd   :  { %2046 = vsyncpa [#allocation4], 1 }

</bundles_post_ra>
